<compile_context>
chip_gen: v5e
topology: v5e:2x2
jax: 0.10.0
libtpu: 0.0.40
codegen_flags: <defaults>
</compile_context>

<pallas_src>
import functools

import jax
import jax.numpy as jnp
from jax.experimental import pallas as pl
from jax.experimental.pallas import tpu as pltpu

_LANES = 128
_TB_MAX = 1024     # perf review: bigger batch tiles amortize the ~0.35 us/step cost


def _round_up(x, m):
    return (x + m - 1) // m * m


def _choose_tb(batch_size, tb_max=_TB_MAX):
    """Largest MXU-friendly batch tile <= tb_max; keep >= 2 grid steps when the
    batch allows it (so v7x's two TensorCores both get work)."""
    tb = min(tb_max, _round_up(batch_size, 256))
    if batch_size > 256 and _round_up(batch_size, tb) // tb < 2:
        tb = _round_up(-(-batch_size // 2), 256)
    return max(tb, 256)


def _default_tanh_dtype():
    """bf16 tanh on v6e/v7x (bf16 EUP, half the h1/h2 footprint); f32 on v5e and
    older chips that have no bf16 VPU/EUP."""
    try:
        kind = jax.devices()[0].device_kind.lower()
    except Exception:
        kind = ""
    legacy = any(s in kind for s in ("v2", "v3", "v4", "v5"))
    return jnp.float32 if legacy else jnp.bfloat16


def _vmem_limit_bytes(tb, dp, hp):
    """Derive the VMEM limit from the real buffer sizes instead of a hard-coded
    constant; cap at 48 MiB so v7x (64 MiB physical) keeps compiler headroom."""
    y_stream = 2 * 2 * tb * dp * 2                       # y1,y0 bf16, double-buffered
    weights = 2 * (dp * hp + hp * hp + hp * dp) + 4 * (2 * hp + dp)
    out_buf = 2 * 8 * dp * 4
    interm = tb * (3 * dp * 4 + 4 * hp * 4)              # f32 upper bound on live temporaries
    need = y_stream + weights + out_buf + interm
    return int(min(max(need * 3 // 2, 16 << 20), 48 << 20))


def _fm_loss_kernel(y1_ref, y0_ref, w1_ref, b1_ref, w2_ref, b2_ref,
                    w3_ref, b3_ref, out_ref, *,
                    batch_size, needs_row_mask, tanh_dtype):
    tb, dp = y1_ref.shape
    f32, bf16 = jnp.float32, jnp.bfloat16

    y1 = y1_ref[...].astype(f32)          # (TB, Dp); lane 0 carries t, padding is zero
    y0 = y0_ref[...].astype(f32)

    # t rides along as lane 0 of both augmented inputs -> no separate t stream.
    t = y1[:, 0:1]
    y_t = t * y1 + (1.0 - t) * y0         # lane 0 stays ~t, padded lanes stay 0

    # MLP velocity field: bf16 MXU matmuls, f32 accumulation.
    h1 = jnp.tanh((jnp.dot(y_t.astype(bf16), w1_ref[...],
                           preferred_element_type=f32) + b1_ref[...]).astype(tanh_dtype))
    h2 = jnp.tanh((jnp.dot(h1.astype(bf16), w2_ref[...],
                           preferred_element_type=f32) + b2_ref[...]).astype(tanh_dtype))
    v = jnp.dot(h2.astype(bf16), w3_ref[...],
                preferred_element_type=f32) + b3_ref[...]

    # Flow-matching target; lane 0 and padded lanes contribute exactly 0
    # (zero-padded weights/bias, and the t lane of (y1 - y0) cancels).
    diff = v - (y1 - y0)
    d2 = diff * diff

    if needs_row_mask:
        # In-kernel batch-padding mask (replaces the old (TB,1) mask DMA stream).
        row = jax.lax.broadcasted_iota(jnp.int32, (tb, 1), 0) + pl.program_id(0) * tb
        d2 = jnp.where(row < batch_size, d2, 0.0)

    # Partial reduction to a dense (8, Dp) tile: the reshape splits the sublane
    # dim into whole (8,128) tiles, the axis-0 sum is pure VPU adds, and the
    # store is a full unmasked (8,128) vst.  Final sum + mean finish in JAX.
    out_ref[...] = d2.reshape(tb // 8, 8, dp).sum(axis=0)


def _prepare_padded(y_1, y_0, t, params, tb):
    """Pad/augment everything to MXU-friendly, lane-dense shapes (pure JAX glue).

    Layout: augmented lane 0 = t, lanes 1..D = data, rest = zero padding.
    y_1 / y_0 are shipped as bf16 to halve the dominant HBM stream.
    """
    W1, Wt1, b1, W2, b2, W3, b3 = params
    B, D = y_1.shape
    H = W1.shape[1]
    Da = D + 1                              # t folded in as lane 0
    Dp = _round_up(Da, _LANES)
    Hp = _round_up(H, _LANES)
    Bp = _round_up(B, tb)

    f32, bf16 = jnp.float32, jnp.bfloat16
    t = t.astype(f32)

    def aug_pad(x):
        xa = jnp.concatenate([t, x.astype(f32)], axis=1)          # (B, 1+D)
        xa = jnp.pad(xa, ((0, Bp - B), (0, Dp - Da)))
        return xa.astype(bf16)

    y1p = aug_pad(y_1)
    y0p = aug_pad(y_0)

    # W1 with the t row (Wt1) stacked on top to match augmented lane 0.
    W1a = jnp.pad(jnp.concatenate([Wt1, W1], axis=0).astype(bf16),
                  ((0, Dp - Da), (0, Hp - H)))
    W2p = jnp.pad(W2.astype(bf16), ((0, Hp - H), (0, Hp - H)))
    # Shift W3/b3 one column right so the model output lines up with the data
    # lanes (1..D); lane 0 and padded lanes stay exactly zero.
    W3p = jnp.pad(W3.astype(bf16), ((0, Hp - H), (1, Dp - Da)))
    b1p = jnp.pad(b1.astype(f32), ((0, 0), (0, Hp - H)))
    b2p = jnp.pad(b2.astype(f32), ((0, 0), (0, Hp - H)))
    b3p = jnp.pad(b3.astype(f32), ((0, 0), (1, Dp - Da)))

    return (y1p, y0p, W1a, b1p, W2p, b2p, W3p, b3p)


def flow_matching_loss(y_1, y_0, t, params, *, tb=None, tanh_dtype=None):
    B, D = y_1.shape
    if tb is None:
        tb = _choose_tb(B)
    assert tb % 8 == 0
    if tanh_dtype is None:
        tanh_dtype = _default_tanh_dtype()

    args = _prepare_padded(y_1, y_0, t, params, tb)
    y1p, W1a = args[0], args[2]
    Bp, Dp = y1p.shape
    Hp = W1a.shape[1]
    nb = Bp // tb

    kernel = functools.partial(
        _fm_loss_kernel,
        batch_size=B,
        needs_row_mask=(Bp != B),
        tanh_dtype=tanh_dtype,
    )

    data_spec = pl.BlockSpec((tb, Dp), lambda i: (i, 0))
    # Whole-array VMEM residency: single copy, DMA'd once, never re-fetched.
    vmem_resident = pl.BlockSpec(memory_space=pltpu.MemorySpace.VMEM)

    grid_spec = pltpu.PrefetchScalarGridSpec(
        num_scalar_prefetch=0,
        grid=(nb,),
        in_specs=[
            data_spec,            # y_1 (augmented, padded, bf16)
            data_spec,            # y_0 (augmented, padded, bf16)
            vmem_resident,        # W1 (+ t row), bf16
            vmem_resident,        # b1, f32
            vmem_resident,        # W2, bf16
            vmem_resident,        # b2, f32
            vmem_resident,        # W3 (shifted), bf16
            vmem_resident,        # b3 (shifted), f32
        ],
        out_specs=pl.BlockSpec((None, 8, Dp), lambda i: (i, 0, 0)),
    )

    cost = pl.CostEstimate(
        flops=2 * Bp * (Dp * Hp + Hp * Hp + Hp * Dp),
        transcendentals=2 * Bp * Hp,
        bytes_accessed=(2 * Bp * 2 * Dp                       # bf16 y1, y0
                        + 2 * (Dp * Hp + Hp * Hp + Hp * Dp)   # bf16 weights
                        + 4 * (2 * Hp + Dp)                   # f32 biases
                        + 4 * nb * 8 * Dp),                   # partial sums out
    )

    partial_sums = pl.pallas_call(
        kernel,
        out_shape=jax.ShapeDtypeStruct((nb, 8, Dp), jnp.float32),
        grid_spec=grid_spec,
        compiler_params=pltpu.CompilerParams(
            dimension_semantics=("parallel",),
            vmem_limit_bytes=_vmem_limit_bytes(tb, Dp, Hp),
        ),
        cost_estimate=cost,
    )(*args)

    # Padded rows/lanes contribute exactly zero -> mean over the true B*D elements.
    return partial_sums.sum() / (B * D)


def init_params(key, input_dim, hidden_dim):
    k1, k2, k3, k4 = jax.random.split(key, 4)
    s_in = 1.0 / jnp.sqrt(jnp.float32(input_dim))
    s_h = 1.0 / jnp.sqrt(jnp.float32(hidden_dim))
    W1 = jax.random.normal(k1, (input_dim, hidden_dim), jnp.float32) * s_in
    Wt1 = jax.random.normal(k2, (1, hidden_dim), jnp.float32)
    b1 = jnp.zeros((1, hidden_dim), jnp.float32)
    W2 = jax.random.normal(k3, (hidden_dim, hidden_dim), jnp.float32) * s_h
    b2 = jnp.zeros((1, hidden_dim), jnp.float32)
    W3 = jax.random.normal(k4, (hidden_dim, input_dim), jnp.float32) * s_h
    b3 = jnp.zeros((1, input_dim), jnp.float32)
    return (W1, Wt1, b1, W2, b2, W3, b3)


def _reference_loss_padded(prep, batch_size, input_dim, tanh_dtype):
    """Pure-JAX mirror of the exact kernel math (same augmentation / bf16 casts)."""
    y1p, y0p, W1a, b1p, W2p, b2p, W3p, b3p = prep
    f32, bf16 = jnp.float32, jnp.bfloat16
    y1 = y1p.astype(f32)
    y0 = y0p.astype(f32)
    t = y1[:, 0:1]
    y_t = t * y1 + (1.0 - t) * y0
    h1 = jnp.tanh((jnp.dot(y_t.astype(bf16), W1a, preferred_element_type=f32) + b1p).astype(tanh_dtype))
    h2 = jnp.tanh((jnp.dot(h1.astype(bf16), W2p, preferred_element_type=f32) + b2p).astype(tanh_dtype))
    v = jnp.dot(h2.astype(bf16), W3p, preferred_element_type=f32) + b3p
    diff = v - (y1 - y0)
    d2 = diff * diff
    row = jnp.arange(y1p.shape[0])[:, None]
    d2 = jnp.where(row < batch_size, d2, 0.0)
    return d2.sum() / (batch_size * input_dim)


def reference_loss_f32(y_1, y_0, t, params):
    """Full-f32 module semantics (no padding, no bf16)."""
    W1, Wt1, b1, W2, b2, W3, b3 = params
    y_t = t * y_1 + (1.0 - t) * y_0
    h1 = jnp.tanh(y_t @ W1 + t * Wt1 + b1)
    h2 = jnp.tanh(h1 @ W2 + b2)
    v = h2 @ W3 + b3
    return jnp.mean((v - (y_1 - y_0)) ** 2)


if __name__ == "__main__":
    B, INPUT_DIM, HIDDEN = 8, 16, 32

    key = jax.random.PRNGKey(0)
    k_data, k_y0, k_t, k_par = jax.random.split(key, 4)

    # "data" sample y_1, base-distribution sample y_0 ~ N(0, I), time t ~ U(0, 1)
    y_1 = jax.random.normal(k_data, (B, INPUT_DIM), jnp.float32)
    y_0 = jax.random.normal(k_y0, (B, INPUT_DIM), jnp.float32)
    t = jax.random.uniform(k_t, (B, 1), jnp.float32)
    params = init_params(k_par, INPUT_DIM, HIDDEN)

    tanh_dtype = _default_tanh_dtype()
    loss_fn = jax.jit(functools.partial(flow_matching_loss, tanh_dtype=tanh_dtype))
    loss = loss_fn(y_1, y_0, t, params)
    jax.block_until_ready(loss)

    # Tight check against a pure-JAX mirror of the kernel math (same bf16/padding).
    tb = _choose_tb(B)
    prep = _prepare_padded(y_1, y_0, t, params, tb)
    ref_mirror = _reference_loss_padded(prep, B, INPUT_DIM, tanh_dtype)
    tight_rtol = 1e-4 if tanh_dtype == jnp.float32 else 1e-2
    assert jnp.allclose(loss, ref_mirror, rtol=tight_rtol, atol=1e-4), (loss, ref_mirror)

    # Loose check against full-f32 module semantics (bf16 input/matmul error only).
    ref_f32 = reference_loss_f32(y_1, y_0, t, params)
    assert jnp.allclose(loss, ref_f32, rtol=7e-2, atol=5e-2), (loss, ref_f32)

    print("KERNEL_OK")
</pallas_src>

<mosaic_0001>
module attributes {stable_mosaic.version = 11 : i64} {
  func.func @_fm_loss_kernel(%arg0: i32, %arg1: memref<256x128xbf16, #tpu.memory_space<vmem>>, %arg2: memref<256x128xbf16, #tpu.memory_space<vmem>>, %arg3: memref<128x128xbf16, #tpu.memory_space<vmem>>, %arg4: memref<1x128xf32, #tpu.memory_space<vmem>>, %arg5: memref<128x128xbf16, #tpu.memory_space<vmem>>, %arg6: memref<1x128xf32, #tpu.memory_space<vmem>>, %arg7: memref<128x128xbf16, #tpu.memory_space<vmem>>, %arg8: memref<1x128xf32, #tpu.memory_space<vmem>>, %arg9: memref<1x8x128xf32, #tpu.memory_space<vmem>>) attributes {dimension_semantics = [#tpu.dimension_semantics<parallel>], iteration_bounds = array<i64: 1>, scalar_prefetch = 0 : i64, scratch_operands = 0 : i64, tpu.core_type = #tpu.core_type<tc>, window_params = [{transform_indices = @transform_0, window_bounds = array<i64: 256, 128>}, {transform_indices = @transform_1, window_bounds = array<i64: 256, 128>}, {pipeline_mode = #tpu.pipeline_mode<synchronous>, transform_indices = @transform_2, window_bounds = array<i64: 128, 128>}, {pipeline_mode = #tpu.pipeline_mode<synchronous>, transform_indices = @transform_3, window_bounds = array<i64: 1, 128>}, {pipeline_mode = #tpu.pipeline_mode<synchronous>, transform_indices = @transform_4, window_bounds = array<i64: 128, 128>}, {pipeline_mode = #tpu.pipeline_mode<synchronous>, transform_indices = @transform_5, window_bounds = array<i64: 1, 128>}, {pipeline_mode = #tpu.pipeline_mode<synchronous>, transform_indices = @transform_6, window_bounds = array<i64: 128, 128>}, {pipeline_mode = #tpu.pipeline_mode<synchronous>, transform_indices = @transform_7, window_bounds = array<i64: 1, 128>}, {transform_indices = @transform_8, window_bounds = array<i64: 1, 8, 128>}]} {
    %c0 = arith.constant 0 : index
    %c0_0 = arith.constant 0 : index
    %0 = vector.load %arg1[%c0, %c0_0] : memref<256x128xbf16, #tpu.memory_space<vmem>>, vector<256x128xbf16>
    %1 = arith.extf %0 : vector<256x128xbf16> to vector<256x128xf32>
    %c0_1 = arith.constant 0 : index
    %c0_2 = arith.constant 0 : index
    %2 = vector.load %arg2[%c0_1, %c0_2] : memref<256x128xbf16, #tpu.memory_space<vmem>>, vector<256x128xbf16>
    %3 = arith.extf %2 : vector<256x128xbf16> to vector<256x128xf32>
    %4 = vector.extract_strided_slice %1 {offsets = [0, 0], sizes = [256, 1], strides = [1, 1]} : vector<256x128xf32> to vector<256x1xf32>
    %5 = vector.broadcast %4 : vector<256x1xf32> to vector<256x128xf32>
    %6 = arith.mulf %5, %1 : vector<256x128xf32>
    %cst = arith.constant 1.000000e+00 : f32
    %7 = vector.broadcast %cst : f32 to vector<256x1xf32>
    %8 = arith.subf %7, %4 : vector<256x1xf32>
    %9 = vector.broadcast %8 : vector<256x1xf32> to vector<256x128xf32>
    %10 = arith.mulf %9, %3 : vector<256x128xf32>
    %11 = arith.addf %6, %10 : vector<256x128xf32>
    %12 = arith.truncf %11 : vector<256x128xf32> to vector<256x128xbf16>
    %c0_3 = arith.constant 0 : index
    %c0_4 = arith.constant 0 : index
    %13 = vector.load %arg3[%c0_3, %c0_4] : memref<128x128xbf16, #tpu.memory_space<vmem>>, vector<128x128xbf16>
    %cst_5 = arith.constant dense<0.000000e+00> : vector<256x128xf32>
    %14 = tpu.matmul %12, %13, %cst_5 {dimension_numbers = #tpu.dot_dimension_numbers<[1], [0], [0], [1], [0, 0, 1, 1], [], []>} : vector<256x128xbf16>, vector<128x128xbf16>, vector<256x128xf32> -> vector<256x128xf32>
    %c0_6 = arith.constant 0 : index
    %c0_7 = arith.constant 0 : index
    %15 = vector.load %arg4[%c0_6, %c0_7] : memref<1x128xf32, #tpu.memory_space<vmem>>, vector<1x128xf32>
    %16 = vector.broadcast %15 : vector<1x128xf32> to vector<256x128xf32>
    %17 = arith.addf %14, %16 : vector<256x128xf32>
    %18 = arith.truncf %17 : vector<256x128xf32> to vector<256x128xbf16>
    %19 = math.tanh %18 : vector<256x128xbf16>
    %c0_8 = arith.constant 0 : index
    %c0_9 = arith.constant 0 : index
    %20 = vector.load %arg5[%c0_8, %c0_9] : memref<128x128xbf16, #tpu.memory_space<vmem>>, vector<128x128xbf16>
    %cst_10 = arith.constant dense<0.000000e+00> : vector<256x128xf32>
    %21 = tpu.matmul %19, %20, %cst_10 {dimension_numbers = #tpu.dot_dimension_numbers<[1], [0], [0], [1], [0, 0, 1, 1], [], []>} : vector<256x128xbf16>, vector<128x128xbf16>, vector<256x128xf32> -> vector<256x128xf32>
    %c0_11 = arith.constant 0 : index
    %c0_12 = arith.constant 0 : index
    %22 = vector.load %arg6[%c0_11, %c0_12] : memref<1x128xf32, #tpu.memory_space<vmem>>, vector<1x128xf32>
    %23 = vector.broadcast %22 : vector<1x128xf32> to vector<256x128xf32>
    %24 = arith.addf %21, %23 : vector<256x128xf32>
    %25 = arith.truncf %24 : vector<256x128xf32> to vector<256x128xbf16>
    %26 = math.tanh %25 : vector<256x128xbf16>
    %c0_13 = arith.constant 0 : index
    %c0_14 = arith.constant 0 : index
    %27 = vector.load %arg7[%c0_13, %c0_14] : memref<128x128xbf16, #tpu.memory_space<vmem>>, vector<128x128xbf16>
    %cst_15 = arith.constant dense<0.000000e+00> : vector<256x128xf32>
    %28 = tpu.matmul %26, %27, %cst_15 {dimension_numbers = #tpu.dot_dimension_numbers<[1], [0], [0], [1], [0, 0, 1, 1], [], []>} : vector<256x128xbf16>, vector<128x128xbf16>, vector<256x128xf32> -> vector<256x128xf32>
    %c0_16 = arith.constant 0 : index
    %c0_17 = arith.constant 0 : index
    %29 = vector.load %arg8[%c0_16, %c0_17] : memref<1x128xf32, #tpu.memory_space<vmem>>, vector<1x128xf32>
    %30 = vector.broadcast %29 : vector<1x128xf32> to vector<256x128xf32>
    %31 = arith.addf %28, %30 : vector<256x128xf32>
    %32 = arith.subf %1, %3 : vector<256x128xf32>
    %33 = arith.subf %31, %32 : vector<256x128xf32>
    %34 = arith.mulf %33, %33 : vector<256x128xf32>
    %35 = tpu.iota {dimensions = array<i32: 0>} : vector<256x1xi32>
    %c256_i32 = arith.constant 256 : i32
    %36 = arith.muli %arg0, %c256_i32 : i32
    %37 = vector.broadcast %36 : i32 to vector<256x1xi32>
    %38 = arith.addi %35, %37 : vector<256x1xi32>
    %c8_i32 = arith.constant 8 : i32
    %39 = vector.broadcast %c8_i32 : i32 to vector<256x1xi32>
    %40 = arith.cmpi slt, %38, %39 : vector<256x1xi32>
    %cst_18 = arith.constant 0.000000e+00 : f32
    %41 = vector.shape_cast %40 : vector<256x1xi1> to vector<256x1xi1>
    %42 = vector.broadcast %41 : vector<256x1xi1> to vector<256x128xi1>
    %43 = vector.broadcast %cst_18 : f32 to vector<256x128xf32>
    %44 = arith.select %42, %34, %43 : vector<256x128xi1>, vector<256x128xf32>
    %45 = vector.shape_cast %44 : vector<256x128xf32> to vector<32x8x128xf32>
    %cst_19 = arith.constant dense<0.000000e+00> : vector<8x128xf32>
    %46 = vector.multi_reduction <add>, %45, %cst_19 [0] : vector<32x8x128xf32> to vector<8x128xf32>
    %c0_20 = arith.constant 0 : index
    %c0_21 = arith.constant 0 : index
    %c0_22 = arith.constant 0 : index
    %47 = vector.load %arg9[%c0_20, %c0_21, %c0_22] : memref<1x8x128xf32, #tpu.memory_space<vmem>>, vector<1x8x128xf32>
    %48 = vector.shape_cast %47 : vector<1x8x128xf32> to vector<8x128xf32>
    %49 = vector.shape_cast %46 : vector<8x128xf32> to vector<1x8x128xf32>
    tpu.vector_store %arg9[%c0_20, %c0_21, %c0_22], %49 {strides = array<i32>} : memref<1x8x128xf32, #tpu.memory_space<vmem>>, vector<1x8x128xf32>,
    return
  }
  func.func @transform_0(%arg0: i32) -> (i32, i32) {
    %c0_i32 = arith.constant 0 : i32
    %c0_i32_0 = arith.constant 0 : i32
    return %arg0, %c0_i32 : i32, i32
  }
  func.func @transform_1(%arg0: i32) -> (i32, i32) {
    %c0_i32 = arith.constant 0 : i32
    %c0_i32_0 = arith.constant 0 : i32
    return %arg0, %c0_i32 : i32, i32
  }
  func.func @transform_2(%arg0: i32) -> (i32, i32) {
    %c0_i32 = arith.constant 0 : i32
    %c0_i32_0 = arith.constant 0 : i32
    %c0_i32_1 = arith.constant 0 : i32
    return %c0_i32, %c0_i32_0 : i32, i32
  }
  func.func @transform_3(%arg0: i32) -> (i32, i32) {
    %c0_i32 = arith.constant 0 : i32
    %c0_i32_0 = arith.constant 0 : i32
    %c0_i32_1 = arith.constant 0 : i32
    return %c0_i32, %c0_i32_0 : i32, i32
  }
  func.func @transform_4(%arg0: i32) -> (i32, i32) {
    %c0_i32 = arith.constant 0 : i32
    %c0_i32_0 = arith.constant 0 : i32
    %c0_i32_1 = arith.constant 0 : i32
    return %c0_i32, %c0_i32_0 : i32, i32
  }
  func.func @transform_5(%arg0: i32) -> (i32, i32) {
    %c0_i32 = arith.constant 0 : i32
    %c0_i32_0 = arith.constant 0 : i32
    %c0_i32_1 = arith.constant 0 : i32
    return %c0_i32, %c0_i32_0 : i32, i32
  }
  func.func @transform_6(%arg0: i32) -> (i32, i32) {
    %c0_i32 = arith.constant 0 : i32
    %c0_i32_0 = arith.constant 0 : i32
    %c0_i32_1 = arith.constant 0 : i32
    return %c0_i32, %c0_i32_0 : i32, i32
  }
  func.func @transform_7(%arg0: i32) -> (i32, i32) {
    %c0_i32 = arith.constant 0 : i32
    %c0_i32_0 = arith.constant 0 : i32
    %c0_i32_1 = arith.constant 0 : i32
    return %c0_i32, %c0_i32_0 : i32, i32
  }
  func.func @transform_8(%arg0: i32) -> (i32, i32, i32) {
    %c0_i32 = arith.constant 0 : i32
    %c0_i32_0 = arith.constant 0 : i32
    %c0_i32_1 = arith.constant 0 : i32
    return %arg0, %c0_i32, %c0_i32_0 : i32, i32, i32
  }
}

</mosaic_0001>

<bundles_post_ra>
// kernel: flow_matching_loss.1
= control target key start
LH: loop header
LB: loop body
LE: loop exit
PB: predicated region body
PF: predicated region fallthrough
CT: control target
= control target key end

     0   :  { %v2128_v0 = vmov 0   ;;  %s2663_s0 = inlined_call_operand.vmem [shape: bf16[256,128], index: 0, kind: input, shape index: {}]   ;;  %s2664_s2 = inlined_call_operand.vmem [shape: bf16[128,128], index: 2, kind: input, shape index: {}]   ;;  %s2665_s1 = inlined_call_operand.vmem [shape: bf16[256,128], index: 1, kind: input, shape index: {}]   ;;  %s2666_s3 = inlined_call_operand.vmem [shape: f32[1,128], index: 3, kind: input, shape index: {}]   ;;  %s2667_s4 = inlined_call_operand.vmem [shape: bf16[128,128], index: 4, kind: input, shape index: {}]   ;;  %s2668_s5 = inlined_call_operand.vmem [shape: f32[1,128], index: 5, kind: input, shape index: {}]   ;;  %s2669_s6 = inlined_call_operand.vmem [shape: bf16[128,128], index: 6, kind: input, shape index: {}]   ;;  %s2670_s7 = inlined_call_operand.vmem [shape: f32[1,128], index: 7, kind: input, shape index: {}]   ;;  %s2671_s8 = inlined_call_operand.vmem [shape: f32[1,8,128], index: 8, kind: output, shape index: {}]  }
   0x1   :  { %1926 = vset.pattern.permute.xlu2 %v2128_v0  ;;  %1920 = vset.pattern.permute.xlu1 %v2128_v0  ;;  %v1859_v1 = vld [vmem:[%s2663_s0 + $0x8] sm:$0xff]   ;;  %v1732_v2 = vld [vmem:[%s2663_s0] sm:$0xff]   ;;  %v1860_v13 = vld [vmem:[%s2663_s0 + $0x10] sm:$0xff]  }
   0x2   :  { %1914 = vset.pattern.permute.xlu0 %v2128_v0  ;;  %v2180_v3 = vunpack.c.l.bf16 %v1859_v1  ;;  %v2182_v4 = vunpack.c.h.bf16 %v1732_v2  ;;  %v2184_v5 = vunpack.c.l.bf16 %v1732_v2  ;;  %v2190_v9 = vunpack.c.h.bf16 %v1859_v1  ;;  %v1861_v19 = vld [vmem:[%s2663_s0 + $0x18] sm:$0xff]   ;;  %v1862_v25 = vld [vmem:[%s2663_s0 + $0x20] sm:$0xff]   ;;  %v1863_v31 = vld [vmem:[%s2663_s0 + $0x28] sm:$0xff]  }
   0x3   :  { %v2199_v14 = vunpack.c.h.bf16 %v1860_v13  ;;  %v2201_v15 = vunpack.c.l.bf16 %v1860_v13  ;;  %v2210_v20 = vunpack.c.h.bf16 %v1861_v19  ;;  %v2212_v21 = vunpack.c.l.bf16 %v1861_v19  ;;  %v1864_v37 = vld [vmem:[%s2663_s0 + $0x30] sm:$0xff]   ;;  %v1865_v43 = vld [vmem:[%s2663_s0 + $0x38] sm:$0xff]   ;;  %v1870_v49 = vld [vmem:[%s2663_s0 + $0x60] sm:$0xff]  }
   0x4   :  { %v351_v6 = vsub.f32 1.0, %v2180_v3  ;;  %v350_v7 = vsub.f32 1.0, %v2182_v4  ;;  %v1915_v8 = vpack.i.bf16 %v2182_v4, %v2184_v5  ;;  %v352_v10 = vsub.f32 1.0, %v2190_v9  ;;  %v1866_v55 = vld [vmem:[%s2663_s0 + $0x40] sm:$0xff]   ;;  %v1714_v58 = vld [vmem:[%s2664_s2 + $0x38] sm:$0xff]  ;;  %v1713_v59 = vld [vmem:[%s2664_s2 + $0x30] sm:$0xff] }
   0x5   :  { %v1921_v11 = vpack.i.bf16 %v2190_v9, %v2180_v3  ;;  %v349_v12 = vsub.f32 1.0, %v2184_v5  ;;  %v354_v16 = vsub.f32 1.0, %v2199_v14  ;;  %v353_v17 = vsub.f32 1.0, %v2201_v15  ;;  %689 = vmatpush.bf16.msra.mxu0 %v1714_v58  ;;  %1889 = vmatpush.bf16.msra.mxu3 %v1714_v58  ;;  %v1871_v63 = vld [vmem:[%s2663_s0 + $0x68] sm:$0xff]   ;;  %v1869_v58 = vld [vmem:[%s2663_s0 + $0x58] sm:$0xff]  }
   0x6   :  { %393 = vperm.xlu2 %1926, %v351_v6   ;;  %388 = vperm.xlu1 %1920, %v350_v7   ;;  %v1927_v18 = vpack.i.bf16 %v2199_v14, %v2201_v15  ;;  %v356_v22 = vsub.f32 1.0, %v2210_v20  ;;  %v355_v23 = vsub.f32 1.0, %v2212_v21  ;;  %v1932_v24 = vpack.i.bf16 %v2210_v20, %v2212_v21  ;;  %v1712_v2 = vld [vmem:[%s2664_s2 + $0x28] sm:$0xff]  ;;  %v1711_v6 = vld [vmem:[%s2664_s2 + $0x20] sm:$0xff] }
   0x7   :  { %1916 = vperm.xlu0 %1914, %v1915_v8   ;;  %v2221_v26 = vunpack.c.h.bf16 %v1862_v25  ;;  %v2223_v27 = vunpack.c.l.bf16 %v1862_v25  ;;  %v2232_v32 = vunpack.c.h.bf16 %v1863_v31  ;;  %v2234_v33 = vunpack.c.l.bf16 %v1863_v31 }
   0x8   :  { %v2243_v38 = vunpack.c.h.bf16 %v1864_v37  ;;  %v2245_v39 = vunpack.c.l.bf16 %v1864_v37  ;;  %v2254_v44 = vunpack.c.h.bf16 %v1865_v43  ;;  %v2256_v45 = vunpack.c.l.bf16 %v1865_v43 }
   0x9   :  { %v358_v28 = vsub.f32 1.0, %v2221_v26  ;;  %v357_v29 = vsub.f32 1.0, %v2223_v27  ;;  %v1937_v30 = vpack.i.bf16 %v2221_v26, %v2223_v27  ;;  %v360_v34 = vsub.f32 1.0, %v2232_v32  ;;  %690 = vmatpush.bf16.msra.mxu0 %v1713_v59  ;;  %1890 = vmatpush.bf16.msra.mxu3 %v1713_v59 }
   0xa   :  { %v359_v35 = vsub.f32 1.0, %v2234_v33  ;;  %v1942_v36 = vpack.i.bf16 %v2232_v32, %v2234_v33  ;;  %v362_v40 = vsub.f32 1.0, %v2243_v38  ;;  %v361_v41 = vsub.f32 1.0, %v2245_v39 }
   0xb   :  { %v1947_v42 = vpack.i.bf16 %v2243_v38, %v2245_v39  ;;  %v364_v46 = vsub.f32 1.0, %v2254_v44  ;;  %v363_v47 = vsub.f32 1.0, %v2256_v45  ;;  %v1952_v48 = vpack.i.bf16 %v2254_v44, %v2256_v45 }
   0xc   :  { %v2265_v50 = vunpack.c.h.bf16 %v1870_v49  ;;  %v2267_v51 = vunpack.c.l.bf16 %v1870_v49  ;;  %v2276_v56 = vunpack.c.h.bf16 %v1866_v55  ;;  %v2278_v57 = vunpack.c.l.bf16 %v1866_v55 }
   0xd   :  { %v2293_v0 = vunpack.c.h.bf16 %v1871_v63  ;;  %v2295_v1 = vunpack.c.l.bf16 %v1871_v63  ;;  %691 = vmatpush.bf16.msra.mxu0 %v1712_v2  ;;  %1891 = vmatpush.bf16.msra.mxu3 %v1712_v2  ;;  %v2370_v59 = vunpack.c.h.bf16 %v1869_v58 }
   0xe   :  { %398 = vperm.xlu2 %1926, %v352_v10   ;;  %1922 = vperm.xlu1 %1920, %v1921_v11   ;;  %v374_v52 = vsub.f32 1.0, %v2265_v50  ;;  %v373_v53 = vsub.f32 1.0, %v2267_v51  ;;  %v1957_v54 = vpack.i.bf16 %v2265_v50, %v2267_v51  ;;  %v366_v60 = vsub.f32 1.0, %v2276_v56  ;;  %v1867_v11 = vld [vmem:[%s2663_s0 + $0x48] sm:$0xff]  }
   0xf   :  { %383 = vperm.xlu0 %1914, %v349_v12   ;;  %v365_v61 = vsub.f32 1.0, %v2278_v57  ;;  %v1962_v62 = vpack.i.bf16 %v2276_v56, %v2278_v57  ;;  %v376_v7 = vsub.f32 1.0, %v2293_v0  ;;  %v375_v8 = vsub.f32 1.0, %v2295_v1 }
  0x10   :  { %v1967_v10 = vpack.i.bf16 %v2293_v0, %v2295_v1  ;;  %v2310_v12 = vunpack.c.h.bf16 %v1867_v11  ;;  %v2312_v13 = vunpack.c.l.bf16 %v1867_v11 }
  0x11   :  { %692 = vmatpush.bf16.msra.mxu0 %v1711_v6  ;;  %1892 = vmatpush.bf16.msra.mxu3 %v1711_v6  ;;  %v372_v6 = vsub.f32 1.0, %v2370_v59 }
  0x12   :  { %v1972_v19 = vpack.i.bf16 %v2310_v12, %v2312_v13 }
  0x16   :  { %408 = vperm.xlu2 %1926, %v354_v16   ;;  %403 = vperm.xlu1 %1920, %v353_v17   ;;  %v1710_v16 = vld [vmem:[%s2664_s2 + $0x18] sm:$0xff]  ;;  %v368_v17 = vsub.f32 1.0, %v2310_v12 }
  0x17   :  { %1928 = vperm.xlu0 %1914, %v1927_v18   ;;  %693 = vmatpush.bf16.msra.mxu0 %v1710_v16  ;;  %v367_v18 = vsub.f32 1.0, %v2312_v13 }
  0x18   :  { %1893 = vmatpush.bf16.msra.mxu3 %v1710_v16 }
  0x1e   :  { %418 = vperm.xlu2 %1926, %v356_v22   ;;  %413 = vperm.xlu1 %1920, %v355_v23   ;;  %v1872_v22 = vld [vmem:[%s2663_s0 + $0x70] sm:$0xff]  }
  0x1f   :  { %1933 = vperm.xlu0 %1914, %v1932_v24   ;;  %v1709_v23 = vld [vmem:[%s2664_s2 + $0x10] sm:$0xff]  ;;  %v2327_v24 = vunpack.c.h.bf16 %v1872_v22  ;;  %v2329_v25 = vunpack.c.l.bf16 %v1872_v22 }
  0x20   :  { %694 = vmatpush.bf16.msra.mxu0 %v1709_v23  ;;  %1894 = vmatpush.bf16.msra.mxu3 %v1709_v23 }
  0x21   :  { %v377_v31 = vsub.f32 1.0, %v2329_v25 }
  0x26   :  { %428 = vperm.xlu2 %1926, %v358_v28   ;;  %423 = vperm.xlu1 %1920, %v357_v29   ;;  %v1708_v28 = vld [vmem:[%s2664_s2 + $0x8] sm:$0xff] }
  0x27   :  { %1938 = vperm.xlu0 %1914, %v1937_v30   ;;  %695 = vmatpush.bf16.msra.mxu0 %v1708_v28  ;;  %v378_v30 = vsub.f32 1.0, %v2327_v24 }
  0x28   :  { %1895 = vmatpush.bf16.msra.mxu3 %v1708_v28 }
  0x2e   :  { %438 = vperm.xlu2 %1926, %v360_v34   ;;  %433 = vperm.xlu1 %1920, %v359_v35   ;;  %v1977_v34 = vpack.i.bf16 %v2327_v24, %v2329_v25  ;;  %v1868_v35 = vld [vmem:[%s2663_s0 + $0x50] sm:$0xff]  }
  0x2f   :  { %1943 = vperm.xlu0 %1914, %v1942_v36   ;;  %v1707_v36 = vld [vmem:[%s2664_s2] sm:$0xff]  ;;  %v2346_v37 = vunpack.c.h.bf16 %v1868_v35 }
  0x30   :  { %696 = vmatpush.bf16.msra.mxu0 %v1707_v36  ;;  %1896 = vmatpush.bf16.msra.mxu3 %v1707_v36 }
  0x36   :  { %448 = vperm.xlu2 %1926, %v362_v40   ;;  %443 = vperm.xlu1 %1920, %v361_v41   ;;  %v2348_v40 = vunpack.c.l.bf16 %v1868_v35 }
  0x37   :  { %1948 = vperm.xlu0 %1914, %v1947_v42   ;;  %v370_v42 = vsub.f32 1.0, %v2346_v37 }
  0x38   :  { %v369_v43 = vsub.f32 1.0, %v2348_v40 }
  0x3e   :  { %458 = vperm.xlu2 %1926, %v364_v46   ;;  %453 = vperm.xlu1 %1920, %v363_v47   ;;  %v1982_v46 = vpack.i.bf16 %v2346_v37, %v2348_v40  ;;  %v1873_v47 = vld [vmem:[%s2663_s0 + $0x78] sm:$0xff]  }
  0x3f   :  { %1953 = vperm.xlu0 %1914, %v1952_v48   ;;  %v2357_v48 = vunpack.c.h.bf16 %v1873_v47  ;;  %v2359_v49 = vunpack.c.l.bf16 %v1873_v47 }
  0x41   :  { %v1987_v55 = vpack.i.bf16 %v2357_v48, %v2359_v49 }
  0x46   :  { %508 = vperm.xlu2 %1926, %v374_v52   ;;  %503 = vperm.xlu1 %1920, %v373_v53   ;;  %v380_v53 = vsub.f32 1.0, %v2357_v48 }
  0x47   :  { %1958 = vperm.xlu0 %1914, %v1957_v54   ;;  %v379_v54 = vsub.f32 1.0, %v2359_v49 }
  0x4e   :  { %468 = vperm.xlu2 %1926, %v366_v60   ;;  %463 = vperm.xlu1 %1920, %v365_v61   ;;  %v2372_v60 = vunpack.c.l.bf16 %v1869_v58 }
  0x4f   :  { %1963 = vperm.xlu0 %1914, %v1962_v62   ;;  %v2377_v62 = vld [vmem:[%s2665_s1] sm:$0xff]  }
  0x56   :  { %518 = vperm.xlu2 %1926, %v376_v7   ;;  %513 = vperm.xlu1 %1920, %v375_v8   ;;  %v371_v7 = vsub.f32 1.0, %v2372_v60  ;;  %v1992_v8 = vpack.i.bf16 %v2370_v59, %v2372_v60 }
  0x57   :  { %1968 = vperm.xlu0 %1914, %v1967_v10   ;;  %v1798_v10 = vunpack.c.h.bf16 %v2377_v62 }
  0x5e   :  { %478 = vperm.xlu2 %1926, %v368_v17   ;;  %473 = vperm.xlu1 %1920, %v367_v18   ;;  %v1797_v17 = vunpack.c.l.bf16 %v2377_v62 }
  0x5f   :  { %1973 = vperm.xlu0 %1914, %v1972_v19  }
  0x60   :  { %v2334_v29 = vpop.permute.xlu2 %393 }
  0x66   :  { %528 = vperm.xlu2 %1926, %v378_v30   ;;  %523 = vperm.xlu1 %1920, %v377_v31  }
  0x67   :  { %1978 = vperm.xlu0 %1914, %v1977_v34  }
  0x68   :  { %v399_v41 = vpop.permute.xlu2 %398 }
  0x6e   :  { %488 = vperm.xlu2 %1926, %v370_v42   ;;  %483 = vperm.xlu1 %1920, %v369_v43   ;;  %v1874_v42 = vld [vmem:[%s2665_s1 + $0x8] sm:$0xff]  }
  0x6f   :  { %1983 = vperm.xlu0 %1914, %v1982_v46   ;;  %v1802_v47 = vunpack.c.h.bf16 %v1874_v42 }
  0x70   :  { %v2361_v52 = vpop.permute.xlu2 %408 }
  0x71   :  { %v544_v58 = vmul.f32 %v1802_v47, %v399_v41 }
  0x76   :  { %538 = vperm.xlu2 %1926, %v380_v53   ;;  %533 = vperm.xlu1 %1920, %v379_v54  }
  0x77   :  { %1988 = vperm.xlu0 %1914, %v1987_v55  }
  0x78   :  { %v389_v61 = vpop.permute.xlu1 %388  ;;  %v2379_v2 = vpop.permute.xlu2 %418 }
  0x79   :  { %v1917_v63 = vpop.permute.xlu0 %1916  ;;  %v542_v18 = vmul.f32 %v1798_v10, %v389_v61 }
  0x7a   :  { %v1919_v11 = vunpack.i.h.bf16 %v1917_v63  ;;  %v1918_v16 = vunpack.i.l.bf16 %v1917_v63 }
  0x7c   :  { %v318_v19 = vmul.f32 %v1919_v11, %v2182_v4  ;;  %v317_v28 = vmul.f32 %v1918_v16, %v2184_v5  ;;  %v1801_v4 = vunpack.c.l.bf16 %v1874_v42 }
  0x7e   :  { %498 = vperm.xlu2 %1926, %v372_v6   ;;  %493 = vperm.xlu1 %1920, %v371_v7   ;;  %v574_v35 = vadd.f32 %v542_v18, %v318_v19  ;;  %v543_v55 = vmul.f32 %v1801_v4, %v2334_v29  ;;  %v1875_v29 = vld [vmem:[%s2665_s1 + $0x10] sm:$0xff]  }
  0x7f   :  { %1993 = vperm.xlu0 %1914, %v1992_v8  }
  0x80   :  { %v1923_v22 = vpop.permute.xlu1 %1922  ;;  %v2391_v31 = vpop.permute.xlu2 %428 }
  0x81   :  { %v384_v23 = vpop.permute.xlu0 %383  ;;  %v1925_v53 = vunpack.i.h.bf16 %v1923_v22  ;;  %v1924_v54 = vunpack.i.l.bf16 %v1923_v22 }
  0x82   :  { %v541_v30 = vmul.f32 %v1797_v17, %v384_v23  ;;  %v1806_v23 = vunpack.c.h.bf16 %v1875_v29 }
  0x83   :  { %v320_v61 = vmul.f32 %v1925_v53, %v2190_v9  ;;  %v319_v63 = vmul.f32 %v1924_v54, %v2180_v3  ;;  %v1805_v3 = vunpack.c.l.bf16 %v1875_v29 }
  0x84   :  { %v573_v34 = vadd.f32 %v541_v30, %v317_v28 }
  0x85   :  { %v575_v10 = vadd.f32 %v543_v55, %v319_v63  ;;  %v576_v11 = vadd.f32 %v544_v58, %v320_v61 }
  0x86   :  { %v605_v36 = vpack.c.bf16 %v574_v35, %v573_v34  ;;  %v546_v34 = vmul.f32 %v1806_v23, %v2361_v52 }
  0x87   :  { %v606_v16 = vpack.c.bf16 %v576_v11, %v575_v10 }
  0x88   :  { %697 = vmatmul.bf16.vlgmr.msra.gmra.mxu0 %v605_v36  ;;  %v404_v43 = vpop.permute.xlu1 %403  ;;  %v2399_v6 = vpop.permute.xlu2 %438 }
  0x89   :  { %v1929_v46 = vpop.permute.xlu0 %1928  ;;  %v545_v35 = vmul.f32 %v1805_v3, %v404_v43 }
  0x8a   :  { %v1931_v22 = vunpack.i.h.bf16 %v1929_v46  ;;  %v1930_v9 = vunpack.i.l.bf16 %v1929_v46 }
  0x8c   :  { %v322_v28 = vmul.f32 %v1931_v22, %v2199_v14  ;;  %v321_v30 = vmul.f32 %v1930_v9, %v2201_v15  ;;  %v1876_v14 = vld [vmem:[%s2665_s1 + $0x18] sm:$0xff]  }
  0x8d   :  { %v1810_v55 = vunpack.c.h.bf16 %v1876_v14  ;;  %v1809_v58 = vunpack.c.l.bf16 %v1876_v14 }
  0x8e   :  { %v577_v47 = vadd.f32 %v545_v35, %v321_v30  ;;  %v578_v53 = vadd.f32 %v546_v34, %v322_v28 }
  0x8f   :  { %v548_v11 = vmul.f32 %v1810_v55, %v2379_v2 }
  0x90   :  { %v414_v7 = vpop.permute.xlu1 %413  ;;  %v2401_v18 = vpop.permute.xlu2 %448  ;;  %v607_v54 = vpack.c.bf16 %v578_v53, %v577_v47 }
  0x91   :  { %v1934_v8 = vpop.permute.xlu0 %1933 }
  0x92   :  { %v1936_v52 = vunpack.i.h.bf16 %v1934_v8  ;;  %v1935_v43 = vunpack.i.l.bf16 %v1934_v8  ;;  %v1885_v8 = vld [vmem:[%s2665_s1 + $0x60] sm:$0xff]  }
  0x93   :  { %v1845_v2 = vunpack.c.l.bf16 %v1885_v8 }
  0x94   :  { %v324_v63 = vmul.f32 %v1936_v52, %v2210_v20  ;;  %v323_v10 = vmul.f32 %v1935_v43, %v2212_v21  ;;  %v1877_v20 = vld [vmem:[%s2665_s1 + $0x20] sm:$0xff]   ;;  %v1846_v21 = vunpack.c.h.bf16 %v1885_v8 }
  0x95   :  { %v1813_v14 = vunpack.c.l.bf16 %v1877_v20 }
  0x96   :  { %v580_v23 = vadd.f32 %v548_v11, %v324_v63 }
  0x98   :  { %702 = vmatmul.bf16.gmra.mxu0 %v606_v16  ;;  %v424_v19 = vpop.permute.xlu1 %423  ;;  %v2413_v4 = vpop.permute.xlu2 %458  ;;  %v547_v16 = vmul.f32 %v1809_v58, %v414_v7 }
  0x99   :  { %v1939_v41 = vpop.permute.xlu0 %1938 }
  0x9a   :  { %v579_v9 = vadd.f32 %v547_v16, %v323_v10  ;;  %v1941_v34 = vunpack.i.h.bf16 %v1939_v41  ;;  %v1940_v35 = vunpack.i.l.bf16 %v1939_v41 }
  0x9c   :  { %v608_v28 = vpack.c.bf16 %v580_v23, %v579_v9  ;;  %v326_v63 = vmul.f32 %v1941_v34, %v2221_v26  ;;  %v325_v10 = vmul.f32 %v1940_v35, %v2223_v27  ;;  %v549_v23 = vmul.f32 %v1813_v14, %v424_v19  ;;  %v1886_v26 = vld [vmem:[%s2665_s1 + $0x68] sm:$0xff]  }
  0x9d   :  { %v1878_v27 = vld [vmem:[%s2665_s1 + $0x28] sm:$0xff]   ;;  %v1849_v19 = vunpack.c.l.bf16 %v1886_v26 }
  0xa0   :  { %v2409_v36 = vpop.permute.xlu1 %433  ;;  %v509_v61 = vpop.permute.xlu2 %508 }
  0xa1   :  { %v2411_v42 = vpop.permute.xlu0 %1943  ;;  %v566_v52 = vmul.f32 %v1846_v21, %v509_v61  ;;  %v581_v61 = vadd.f32 %v549_v23, %v325_v10 }
  0xa8   :  { %707 = vmatmul.bf16.gmra.mxu0 %v607_v54  ;;  %v2415_v46 = vpop.permute.xlu1 %443  ;;  %v2432_v3 = vpop.permute.xlu2 %468  ;;  %v1814_v54 = vunpack.c.h.bf16 %v1877_v20 }
  0xa9   :  { %v2420_v15 = vpop.permute.xlu0 %1948 }
  0xaa   :  { %v550_v9 = vmul.f32 %v1814_v54, %v2391_v31  ;;  %v1850_v31 = vunpack.c.h.bf16 %v1886_v26  ;;  %v1817_v54 = vunpack.c.l.bf16 %v1878_v27  ;;  %v1722_v26 = vld [vmem:[%s2667_s4 + $0x38] sm:$0xff] }
  0xab   :  { %942 = vmatpush.bf16.msra.mxu1 %v1722_v26  ;;  %1897 = vmatpush.bf16.msrb.mxu3 %v1722_v26 }
  0xb0   :  { %v2425_v29 = vpop.permute.xlu1 %453  ;;  %v519_v41 = vpop.permute.xlu2 %518 }
  0xb1   :  { %v2427_v22 = vpop.permute.xlu0 %1953  ;;  %v568_v14 = vmul.f32 %v1850_v31, %v519_v41  ;;  %v1950_v31 = vunpack.i.l.bf16 %v2420_v15 }
  0xb8   :  { %712 = vmatmul.bf16.gmra.mxu0 %v608_v28  ;;  %v504_v7 = vpop.permute.xlu1 %503  ;;  %v2454_v34 = vpop.permute.xlu2 %478 }
  0xb9   :  { %v1959_v30 = vpop.permute.xlu0 %1958  ;;  %v565_v43 = vmul.f32 %v1845_v2, %v504_v7  ;;  %v1946_v7 = vunpack.i.h.bf16 %v2411_v42 }
  0xba   :  { %v1961_v47 = vunpack.i.h.bf16 %v1959_v30  ;;  %v1960_v53 = vunpack.i.l.bf16 %v1959_v30  ;;  %v1945_v30 = vunpack.i.l.bf16 %v2411_v42 }
  0xbc   :  { %v342_v55 = vmul.f32 %v1961_v47, %v2265_v50  ;;  %v341_v58 = vmul.f32 %v1960_v53, %v2267_v51  ;;  %v582_v50 = vadd.f32 %v550_v9, %v326_v63  ;;  %v1818_v53 = vunpack.c.h.bf16 %v1878_v27 }
  0xbd   :  { %v327_v63 = vmul.f32 %v1945_v30, %v2234_v33 }
  0xbe   :  { %v597_v11 = vadd.f32 %v565_v43, %v341_v58  ;;  %v598_v16 = vadd.f32 %v566_v52, %v342_v55  ;;  %v609_v51 = vpack.c.bf16 %v582_v50, %v581_v61  ;;  %v328_v58 = vmul.f32 %v1946_v7, %v2232_v32  ;;  %v1887_v32 = vld [vmem:[%s2665_s1 + $0x70] sm:$0xff]  }
  0xbf   :  { %v552_v42 = vmul.f32 %v1818_v53, %v2399_v6  ;;  %v1854_v6 = vunpack.c.h.bf16 %v1887_v32 }
  0xc0   :  { %v2442_v8 = vpop.permute.xlu1 %463  ;;  %v617_v28 = vpack.c.bf16 %v598_v16, %v597_v11  ;;  %v551_v16 = vmul.f32 %v1817_v54, %v2409_v36  ;;  %v529_v61 = vpop.permute.xlu2 %528  ;;  %v1853_v36 = vunpack.c.l.bf16 %v1887_v32 }
  0xc1   :  { %v2444_v20 = vpop.permute.xlu0 %1963 }
  0xc2   :  { %757 = vmatmul.bf16.vlgmr.msra.gmra.mxu3 %v617_v28  ;;  %v583_v41 = vadd.f32 %v551_v16, %v327_v63 }
  0xc8   :  { %717 = vmatmul.bf16.gmra.mxu0 %v609_v51  ;;  %v514_v21 = vpop.permute.xlu1 %513  ;;  %v1951_v51 = vunpack.i.h.bf16 %v2420_v15  ;;  %v329_v15 = vmul.f32 %v1950_v31, %v2245_v39  ;;  %v1720_v39 = vld [vmem:[%s2667_s4 + $0x28] sm:$0xff] }
  0xc9   :  { %v1969_v2 = vpop.permute.xlu0 %1968  ;;  %v567_v52 = vmul.f32 %v1849_v19, %v514_v21 }
  0xca   :  { %v1971_v35 = vunpack.i.h.bf16 %v1969_v2  ;;  %v1970_v47 = vunpack.i.l.bf16 %v1969_v2  ;;  %v1721_v2 = vld [vmem:[%s2667_s4 + $0x30] sm:$0xff] }
  0xcb   :  { %943 = vmatpush.bf16.msra.mxu1 %v1721_v2  ;;  %1898 = vmatpush.bf16.msrb.mxu3 %v1721_v2 }
  0xcc   :  { %v344_v43 = vmul.f32 %v1971_v35, %v2293_v0  ;;  %v343_v55 = vmul.f32 %v1970_v47, %v2295_v1  ;;  %v584_v0 = vadd.f32 %v552_v42, %v328_v58  ;;  %v1879_v1 = vld [vmem:[%s2665_s1 + $0x30] sm:$0xff]   ;;  %v570_v35 = vmul.f32 %v1854_v6, %v529_v61  ;;  %v1888_v42 = vld [vmem:[%s2665_s1 + $0x78] sm:$0xff]  }
  0xcd   :  { %v1822_v7 = vunpack.c.h.bf16 %v1879_v1  ;;  %v1821_v30 = vunpack.c.l.bf16 %v1879_v1  ;;  %v1955_v1 = vunpack.i.l.bf16 %v2427_v22 }
  0xce   :  { %v599_v10 = vadd.f32 %v567_v52, %v343_v55  ;;  %v600_v11 = vadd.f32 %v568_v14, %v344_v43  ;;  %v610_v33 = vpack.c.bf16 %v584_v0, %v583_v41  ;;  %v330_v14 = vmul.f32 %v1951_v51, %v2243_v38  ;;  %v2484_v52 = vpop.permute.xlu2 %488  ;;  %v1719_v0 = vld [vmem:[%s2667_s4 + $0x20] sm:$0xff] }
  0xcf   :  { %v554_v58 = vmul.f32 %v1822_v7, %v2401_v18  ;;  %v553_v63 = vmul.f32 %v1821_v30, %v2415_v46  ;;  %944 = vmatpush.bf16.msra.mxu1 %v1720_v39  ;;  %1899 = vmatpush.bf16.msrb.mxu3 %v1720_v39  ;;  %v1880_v18 = vld [vmem:[%s2665_s1 + $0x38] sm:$0xff]   ;;  %v1858_v46 = vunpack.c.h.bf16 %v1888_v42  ;;  %v1857_v41 = vunpack.c.l.bf16 %v1888_v42 }
  0xd0   :  { %v2462_v9 = vpop.permute.xlu1 %473  ;;  %v618_v23 = vpack.c.bf16 %v600_v11, %v599_v10  ;;  %v1825_v26 = vunpack.c.l.bf16 %v1880_v18 }
  0xd1   :  { %v2464_v28 = vpop.permute.xlu0 %1973  ;;  %v586_v38 = vadd.f32 %v554_v58, %v330_v14  ;;  %v1966_v14 = vunpack.i.h.bf16 %v2444_v20 }
  0xd2   :  { %762 = vmatmul.bf16.gmra.mxu3 %v618_v23 }
  0xd3   :  { %945 = vmatpush.bf16.msra.mxu1 %v1719_v0  ;;  %1900 = vmatpush.bf16.msrb.mxu3 %v1719_v0  ;;  %v334_v58 = vmul.f32 %v1966_v14, %v2276_v56  ;;  %v2541_v56 = vld [vmem:[%s2666_s3] ss:$0 sm:$0xff] }
  0xd6   :  { %v539_v23 = vpop.permute.xlu2 %538 }
  0xd7   :  { %v572_v51 = vmul.f32 %v1858_v46, %v539_v23  ;;  %v1975_v46 = vunpack.i.l.bf16 %v2464_v28 }
  0xd8   :  { %722 = vmatmul.bf16.gmra.mxu0 %v610_v33  ;;  %v524_v50 = vpop.permute.xlu1 %523  ;;  %v1956_v33 = vunpack.i.h.bf16 %v2427_v22  ;;  %v331_v22 = vmul.f32 %v1955_v1, %v2256_v45 }
  0xd9   :  { %v1979_v27 = vpop.permute.xlu0 %1978  ;;  %v569_v47 = vmul.f32 %v1853_v36, %v524_v50  ;;  %v1826_v50 = vunpack.c.h.bf16 %v1880_v18  ;;  %v1976_v18 = vunpack.i.h.bf16 %v2464_v28 }
  0xda   :  { %v1981_v19 = vunpack.i.h.bf16 %v1979_v27  ;;  %v1980_v21 = vunpack.i.l.bf16 %v1979_v27  ;;  %v332_v2 = vmul.f32 %v1956_v33, %v2254_v44  ;;  %v1716_v44 = vld [vmem:[%s2667_s4 + $0x8] sm:$0xff] }
  0xdb   :  { %v336_v23 = vmul.f32 %v1976_v18, %v2310_v12  ;;  %v1883_v12 = vld [vmem:[%s2665_s1 + $0x50] sm:$0xff]  }
  0xdc   :  { %v346_v53 = vmul.f32 %v1981_v19, %v2327_v24  ;;  %v345_v54 = vmul.f32 %v1980_v21, %v2329_v25  ;;  %v585_v25 = vadd.f32 %v553_v63, %v329_v15  ;;  %v1718_v21 = vld [vmem:[%s2667_s4 + $0x18] sm:$0xff]  ;;  %v1965_v15 = vunpack.i.l.bf16 %v2444_v20  ;;  %v1882_v20 = vld [vmem:[%s2665_s1 + $0x48] sm:$0xff]  }
  0xdd   :  { %946 = vmatpush.bf16.msra.mxu1 %v1718_v21  ;;  %1901 = vmatpush.bf16.msrb.mxu3 %v1718_v21 }
  0xde   :  { %v601_v43 = vadd.f32 %v569_v47, %v345_v54  ;;  %v602_v55 = vadd.f32 %v570_v35, %v346_v53  ;;  %v611_v16 = vpack.c.bf16 %v586_v38, %v585_v25  ;;  %v556_v35 = vmul.f32 %v1826_v50, %v2413_v4  ;;  %v1715_v4 = vld [vmem:[%s2667_s4] sm:$0xff] }
  0xdf   :  { %v555_v47 = vmul.f32 %v1825_v26, %v2425_v29  ;;  %v1881_v29 = vld [vmem:[%s2665_s1 + $0x40] sm:$0xff]   ;;  %v333_v63 = vmul.f32 %v1965_v15, %v2278_v57  ;;  %v1834_v57 = vunpack.c.h.bf16 %v1882_v20 }
  0xe0   :  { %v2488_v10 = vpop.permute.xlu1 %483  ;;  %v619_v11 = vpack.c.bf16 %v602_v55, %v601_v43  ;;  %v588_v54 = vadd.f32 %v556_v35, %v332_v2  ;;  %v1830_v43 = vunpack.c.h.bf16 %v1881_v29  ;;  %v1829_v55 = vunpack.c.l.bf16 %v1881_v29 }
  0xe1   :  { %v2490_v24 = vpop.permute.xlu0 %1983 }
  0xe2   :  { %767 = vmatmul.bf16.gmra.mxu3 %v619_v11  ;;  %v558_v11 = vmul.f32 %v1830_v43, %v2432_v3  ;;  %v557_v25 = vmul.f32 %v1829_v55, %v2442_v8  ;;  %v1833_v3 = vunpack.c.l.bf16 %v1882_v20  ;;  %v499_v43 = vpop.permute.xlu2 %498 }
  0xe4   :  { %v589_v38 = vadd.f32 %v557_v25, %v333_v63  ;;  %v590_v39 = vadd.f32 %v558_v11, %v334_v58  ;;  %v559_v28 = vmul.f32 %v1833_v3, %v2462_v9 }
  0xe8   :  { %727 = vmatmul.bf16.gmra.mxu0 %v611_v16  ;;  %v534_v61 = vpop.permute.xlu1 %533  ;;  %v613_v16 = vpack.c.bf16 %v590_v39, %v589_v38 }
  0xe9   :  { %v1989_v32 = vpop.permute.xlu0 %1988  ;;  %v571_v27 = vmul.f32 %v1857_v41, %v534_v61  ;;  %v335_v41 = vmul.f32 %v1975_v46, %v2312_v13 }
  0xea   :  { %v1991_v6 = vunpack.i.h.bf16 %v1989_v32  ;;  %v1990_v36 = vunpack.i.l.bf16 %v1989_v32  ;;  %v560_v32 = vmul.f32 %v1834_v57, %v2454_v34  ;;  %v1985_v34 = vunpack.i.l.bf16 %v2490_v24 }
  0xec   :  { %v348_v31 = vmul.f32 %v1991_v6, %v2357_v48  ;;  %v347_v19 = vmul.f32 %v1990_v36, %v2359_v49  ;;  %v1717_v48 = vld [vmem:[%s2667_s4 + $0x10] sm:$0xff]  ;;  %v587_v49 = vadd.f32 %v555_v47, %v331_v22  ;;  %v591_v36 = vadd.f32 %v559_v28, %v335_v41 }
  0xed   :  { %947 = vmatpush.bf16.msra.mxu1 %v1717_v48  ;;  %1902 = vmatpush.bf16.msrb.mxu3 %v1717_v48  ;;  %v592_v50 = vadd.f32 %v560_v32, %v336_v23 }
  0xee   :  { %v603_v7 = vadd.f32 %v571_v27, %v347_v19  ;;  %v604_v30 = vadd.f32 %v572_v51, %v348_v31  ;;  %v612_v45 = vpack.c.bf16 %v588_v54, %v587_v49  ;;  %v1986_v27 = vunpack.i.h.bf16 %v2490_v24 }
  0xef   :  { %v614_v51 = vpack.c.bf16 %v592_v50, %v591_v36  ;;  %v1838_v31 = vunpack.c.h.bf16 %v1883_v12  ;;  %v1837_v19 = vunpack.c.l.bf16 %v1883_v12 }
  0xf0   :  { %v620_v53 = vpack.c.bf16 %v604_v30, %v603_v7  ;;  %v338_v22 = vmul.f32 %v1986_v27, %v2346_v37  ;;  %v337_v7 = vmul.f32 %v1985_v34, %v2348_v40  ;;  %v1884_v40 = vld [vmem:[%s2665_s1 + $0x58] sm:$0xff]   ;;  %v494_v63 = vpop.permute.xlu1 %493 }
  0xf1   :  { %948 = vmatpush.bf16.msra.mxu1 %v1716_v44  ;;  %1903 = vmatpush.bf16.msrb.mxu3 %v1716_v44  ;;  %v562_v47 = vmul.f32 %v1838_v31, %v2484_v52  ;;  %v1841_v55 = vunpack.c.l.bf16 %v1884_v40 }
  0xf2   :  { %772 = vmatmul.bf16.gmra.mxu3 %v620_v53  ;;  %v561_v53 = vmul.f32 %v1837_v19, %v2488_v10  ;;  %v1842_v10 = vunpack.c.h.bf16 %v1884_v40 }
  0xf3   :  { %v594_v44 = vadd.f32 %v562_v47, %v338_v22  ;;  %v563_v20 = vmul.f32 %v1841_v55, %v494_v63 }
  0xf4   :  { %v593_v54 = vadd.f32 %v561_v53, %v337_v7 }
  0xf5   :  { %949 = vmatpush.bf16.msra.mxu1 %v1715_v4  ;;  %1904 = vmatpush.bf16.msrb.mxu3 %v1715_v4  ;;  %v1994_v4 = vpop.permute.xlu0 %1993 }
  0xf6   :  { %v615_v37 = vpack.c.bf16 %v594_v44, %v593_v54  ;;  %v1996_v14 = vunpack.i.h.bf16 %v1994_v4  ;;  %v1995_v52 = vunpack.i.l.bf16 %v1994_v4 }
  0xf8   :  { %732 = vmatmul.bf16.gmra.mxu0 %v612_v45  ;;  %v340_v25 = vmul.f32 %v1996_v14, %v2370_v59  ;;  %v339_v38 = vmul.f32 %v1995_v52, %v2372_v60 }
  0xfa   :  { %v595_v3 = vadd.f32 %v563_v20, %v339_v38 }
 0x105   :  { %v698_v42 = vpop.f32.mrf.mxu0 }
 0x106   :  { %v699_v0 = vadd.f32 %v2541_v56, %v698_v42 }
 0x108   :  { %737 = vmatmul.bf16.gmra.mxu0 %v613_v16  ;;  %v564_v16 = vmul.f32 %v1842_v10, %v499_v43 }
 0x10d   :  { %v700_v8 = vpop.f32.mrf.mxu0 }
 0x10e   :  { %v701_v61 = vadd.f32 %v2541_v56, %v700_v8  ;;  %v596_v8 = vadd.f32 %v564_v16, %v340_v25 }
 0x110   :  { %v778_v33 = vpack.c.bf16 %v701_v61, %v699_v0  ;;  %v616_v41 = vpack.c.bf16 %v596_v8, %v595_v3 }
 0x112   :  { %v794_v1 = vunpack.c.l.bf16 %v778_v33  ;;  %v795_v6 = vunpack.c.h.bf16 %v778_v33 }
 0x114   :  { %2000 = vtanh.f32 %v794_v1 }
 0x115   :  { %2002 = vtanh.f32 %v795_v6  ;;  %v703_v26 = vpop.f32.mrf.mxu0 }
 0x116   :  { %v704_v30 = vadd.f32 %v2541_v56, %v703_v26 }
 0x118   :  { %742 = vmatmul.bf16.gmra.mxu0 %v614_v51 }
 0x11a   :  { %v2001_v13 = vpop.eup %2000 }
 0x11b   :  { %v2003_v9 = vpop.eup %2002 }
 0x11c   :  { %v858_v21 = vpack.c.bf16 %v2003_v9, %v2001_v13 }
 0x11d   :  { %v705_v2 = vpop.f32.mrf.mxu0 }
 0x11e   :  { %v706_v35 = vadd.f32 %v2541_v56, %v705_v2  ;;  %950 = vmatmul.bf16.vlgmr.msra.gmra.mxu1 %v858_v21 }
 0x120   :  { %v779_v48 = vpack.c.bf16 %v706_v35, %v704_v30 }
 0x122   :  { %v796_v24 = vunpack.c.l.bf16 %v779_v48  ;;  %v797_v49 = vunpack.c.h.bf16 %v779_v48 }
 0x124   :  { %2004 = vtanh.f32 %v796_v24 }
 0x125   :  { %2006 = vtanh.f32 %v797_v49  ;;  %v708_v45 = vpop.f32.mrf.mxu0 }
 0x126   :  { %v709_v39 = vadd.f32 %v2541_v56, %v708_v45 }
 0x128   :  { %747 = vmatmul.bf16.gmra.mxu0 %v615_v37 }
 0x12a   :  { %v2005_v29 = vpop.eup %2004 }
 0x12b   :  { %v2007_v15 = vpop.eup %2006 }
 0x12c   :  { %v859_v58 = vpack.c.bf16 %v2007_v15, %v2005_v29 }
 0x12d   :  { %v710_v11 = vpop.f32.mrf.mxu0 }
 0x12e   :  { %v711_v42 = vadd.f32 %v2541_v56, %v710_v11  ;;  %955 = vmatmul.bf16.gmra.mxu1 %v859_v58 }
 0x130   :  { %v780_v18 = vpack.c.bf16 %v711_v42, %v709_v39 }
 0x132   :  { %v798_v46 = vunpack.c.l.bf16 %v780_v18  ;;  %v799_v57 = vunpack.c.h.bf16 %v780_v18 }
 0x134   :  { %2008 = vtanh.f32 %v798_v46 }
 0x135   :  { %2010 = vtanh.f32 %v799_v57  ;;  %v713_v23 = vpop.f32.mrf.mxu0 }
 0x136   :  { %v714_v32 = vadd.f32 %v2541_v56, %v713_v23 }
 0x138   :  { %752 = vmatmul.bf16.gmra.mxu0 %v616_v41 }
 0x13a   :  { %v2009_v59 = vpop.eup %2008 }
 0x13b   :  { %v2011_v0 = vpop.eup %2010 }
 0x13c   :  { %v860_v60 = vpack.c.bf16 %v2011_v0, %v2009_v59 }
 0x13d   :  { %v715_v61 = vpop.f32.mrf.mxu0 }
 0x13e   :  { %v716_v28 = vadd.f32 %v2541_v56, %v715_v61  ;;  %960 = vmatmul.bf16.gmra.mxu1 %v860_v60 }
 0x140   :  { %v781_v33 = vpack.c.bf16 %v716_v28, %v714_v32 }
 0x142   :  { %v800_v1 = vunpack.c.l.bf16 %v781_v33  ;;  %v801_v6 = vunpack.c.h.bf16 %v781_v33  ;;  %v1730_v33 = vld [vmem:[%s2669_s6 + $0x38] sm:$0xff] }
 0x143   :  { %1195 = vmatpush.bf16.msra.mxu2 %v1730_v33  ;;  %1905 = vmatpush.bf16.msra.mxu3 %v1730_v33 }
 0x144   :  { %2012 = vtanh.f32 %v800_v1 }
 0x145   :  { %2014 = vtanh.f32 %v801_v6  ;;  %v718_v36 = vpop.f32.mrf.mxu0  ;;  %v758_v50 = vpop.f32.mrf.mxu3 }
 0x146   :  { %v719_v34 = vadd.f32 %v2541_v56, %v718_v36  ;;  %v759_v9 = vadd.f32 %v2541_v56, %v758_v50  ;;  %v1729_v36 = vld [vmem:[%s2669_s6 + $0x30] sm:$0xff] }
 0x147   :  { %1196 = vmatpush.bf16.msra.mxu2 %v1729_v36  ;;  %1906 = vmatpush.bf16.msra.mxu3 %v1729_v36 }
 0x14a   :  { %v2013_v26 = vpop.eup %2012 }
 0x14b   :  { %v2015_v51 = vpop.eup %2014 }
 0x14c   :  { %v861_v12 = vpack.c.bf16 %v2015_v51, %v2013_v26 }
 0x14d   :  { %v720_v13 = vpop.f32.mrf.mxu0  ;;  %v760_v27 = vpop.f32.mrf.mxu3 }
 0x14e   :  { %v721_v31 = vadd.f32 %v2541_v56, %v720_v13  ;;  %v761_v19 = vadd.f32 %v2541_v56, %v760_v27  ;;  %965 = vmatmul.bf16.gmra.mxu1 %v861_v12  ;;  %v1728_v13 = vld [vmem:[%s2669_s6 + $0x28] sm:$0xff] }
 0x14f   :  { %1197 = vmatpush.bf16.msra.mxu2 %v1728_v13  ;;  %1907 = vmatpush.bf16.msra.mxu3 %v1728_v13 }
 0x150   :  { %v782_v21 = vpack.c.bf16 %v721_v31, %v719_v34  ;;  %v790_v2 = vpack.c.bf16 %v761_v19, %v759_v9 }
 0x152   :  { %v802_v22 = vunpack.c.l.bf16 %v782_v21  ;;  %v803_v7 = vunpack.c.h.bf16 %v782_v21  ;;  %v818_v30 = vunpack.c.l.bf16 %v790_v2  ;;  %v819_v35 = vunpack.c.h.bf16 %v790_v2 }
 0x154   :  { %2016 = vtanh.f32 %v802_v22 }
 0x155   :  { %2018 = vtanh.f32 %v803_v7  ;;  %v723_v47 = vpop.f32.mrf.mxu0  ;;  %v763_v53 = vpop.f32.mrf.mxu3 }
 0x156   :  { %2020 = vtanh.f32 %v818_v30  ;;  %v724_v45 = vadd.f32 %v2541_v56, %v723_v47  ;;  %v764_v40 = vadd.f32 %v2541_v56, %v763_v53 }
 0x157   :  { %2022 = vtanh.f32 %v819_v35  ;;  %v1727_v35 = vld [vmem:[%s2669_s6 + $0x20] sm:$0xff] }
 0x158   :  { %1198 = vmatpush.bf16.msra.mxu2 %v1727_v35  ;;  %1908 = vmatpush.bf16.msra.mxu3 %v1727_v35 }
 0x15a   :  { %v2017_v48 = vpop.eup %2016 }
 0x15b   :  { %v2019_v24 = vpop.eup %2018 }
 0x15c   :  { %v2021_v49 = vpop.eup %2020  ;;  %v862_v54 = vpack.c.bf16 %v2019_v24, %v2017_v48 }
 0x15d   :  { %v2023_v44 = vpop.eup %2022  ;;  %v725_v37 = vpop.f32.mrf.mxu0 }
 0x15e   :  { %v765_v4 = vpop.f32.mrf.mxu3  ;;  %v726_v29 = vadd.f32 %v2541_v56, %v725_v37  ;;  %970 = vmatmul.bf16.gmra.mxu1 %v862_v54  ;;  %v870_v52 = vpack.c.bf16 %v2023_v44, %v2021_v49  ;;  %v1726_v49 = vld [vmem:[%s2669_s6 + $0x18] sm:$0xff]  ;;  %v1725_v44 = vld [vmem:[%s2669_s6 + $0x10] sm:$0xff] }
 0x15f   :  { %v766_v14 = vadd.f32 %v2541_v56, %v765_v4  ;;  %1199 = vmatpush.bf16.msra.mxu2 %v1726_v49  ;;  %1909 = vmatpush.bf16.msra.mxu3 %v1726_v49 }
 0x160   :  { %v783_v15 = vpack.c.bf16 %v726_v29, %v724_v45  ;;  %1010 = vmatmul.bf16.vlgmr.msrb.gmra.mxu3 %v870_v52  ;;  %v1724_v29 = vld [vmem:[%s2669_s6 + $0x8] sm:$0xff] }
 0x161   :  { %v791_v10 = vpack.c.bf16 %v766_v14, %v764_v40 }
 0x162   :  { %v804_v43 = vunpack.c.l.bf16 %v783_v15  ;;  %v805_v55 = vunpack.c.h.bf16 %v783_v15 }
 0x163   :  { %v820_v58 = vunpack.c.l.bf16 %v791_v10  ;;  %v821_v63 = vunpack.c.h.bf16 %v791_v10  ;;  %1200 = vmatpush.bf16.msra.mxu2 %v1725_v44  ;;  %1910 = vmatpush.bf16.msra.mxu3 %v1725_v44 }
 0x164   :  { %2024 = vtanh.f32 %v804_v43 }
 0x165   :  { %2026 = vtanh.f32 %v805_v55  ;;  %v728_v11 = vpop.f32.mrf.mxu0 }
 0x166   :  { %v768_v25 = vpop.f32.mrf.mxu3  ;;  %2028 = vtanh.f32 %v820_v58  ;;  %v729_v18 = vadd.f32 %v2541_v56, %v728_v11  ;;  %v1723_v58 = vld [vmem:[%s2669_s6] sm:$0xff] }
 0x167   :  { %2030 = vtanh.f32 %v821_v63  ;;  %v769_v3 = vadd.f32 %v2541_v56, %v768_v25  ;;  %1201 = vmatpush.bf16.msra.mxu2 %v1724_v29  ;;  %1911 = vmatpush.bf16.msra.mxu3 %v1724_v29 }
 0x16a   :  { %v2025_v38 = vpop.eup %2024 }
 0x16b   :  { %v2027_v39 = vpop.eup %2026  ;;  %1202 = vmatpush.bf16.msra.mxu2 %v1723_v58  ;;  %1912 = vmatpush.bf16.msra.mxu3 %v1723_v58 }
 0x16c   :  { %v2029_v42 = vpop.eup %2028  ;;  %v863_v16 = vpack.c.bf16 %v2027_v39, %v2025_v38 }
 0x16d   :  { %v2031_v20 = vpop.eup %2030  ;;  %v730_v46 = vpop.f32.mrf.mxu0 }
 0x16e   :  { %v770_v57 = vpop.f32.mrf.mxu3  ;;  %v731_v8 = vadd.f32 %v2541_v56, %v730_v46  ;;  %975 = vmatmul.bf16.gmra.mxu1 %v863_v16  ;;  %v871_v41 = vpack.c.bf16 %v2031_v20, %v2029_v42 }
 0x16f   :  { %v771_v23 = vadd.f32 %v2541_v56, %v770_v57  ;;  %v2616_v57 = vld [vmem:[%s2668_s5] ss:$0 sm:$0xff] }
 0x170   :  { %v784_v59 = vpack.c.bf16 %v731_v8, %v729_v18  ;;  %1015 = vmatmul.bf16.gmra.mxu3 %v871_v41 }
 0x171   :  { %v792_v0 = vpack.c.bf16 %v771_v23, %v769_v3 }
 0x172   :  { %v806_v60 = vunpack.c.l.bf16 %v784_v59  ;;  %v807_v61 = vunpack.c.h.bf16 %v784_v59 }
 0x173   :  { %v822_v32 = vunpack.c.l.bf16 %v792_v0  ;;  %v823_v28 = vunpack.c.h.bf16 %v792_v0 }
 0x174   :  { %2032 = vtanh.f32 %v806_v60 }
 0x175   :  { %2034 = vtanh.f32 %v807_v61  ;;  %v733_v1 = vpop.f32.mrf.mxu0 }
 0x176   :  { %v773_v6 = vpop.f32.mrf.mxu3  ;;  %2036 = vtanh.f32 %v822_v32  ;;  %v734_v34 = vadd.f32 %v2541_v56, %v733_v1 }
 0x177   :  { %2038 = vtanh.f32 %v823_v28  ;;  %v774_v9 = vadd.f32 %v2541_v56, %v773_v6 }
 0x17a   :  { %v2033_v50 = vpop.eup %2032 }
 0x17b   :  { %v2035_v26 = vpop.eup %2034 }
 0x17c   :  { %v2037_v51 = vpop.eup %2036  ;;  %v864_v12 = vpack.c.bf16 %v2035_v26, %v2033_v50 }
 0x17d   :  { %v2039_v27 = vpop.eup %2038  ;;  %v735_v31 = vpop.f32.mrf.mxu0 }
 0x17e   :  { %v775_v19 = vpop.f32.mrf.mxu3  ;;  %v736_v21 = vadd.f32 %v2541_v56, %v735_v31  ;;  %980 = vmatmul.bf16.gmra.mxu1 %v864_v12  ;;  %v872_v22 = vpack.c.bf16 %v2039_v27, %v2037_v51 }
 0x17f   :  { %v776_v2 = vadd.f32 %v2541_v56, %v775_v19 }
 0x180   :  { %v785_v7 = vpack.c.bf16 %v736_v21, %v734_v34  ;;  %1020 = vmatmul.bf16.gmra.mxu3 %v872_v22 }
 0x181   :  { %v793_v30 = vpack.c.bf16 %v776_v2, %v774_v9 }
 0x182   :  { %v808_v47 = vunpack.c.l.bf16 %v785_v7  ;;  %v809_v53 = vunpack.c.h.bf16 %v785_v7 }
 0x183   :  { %v824_v48 = vunpack.c.l.bf16 %v793_v30  ;;  %v825_v24 = vunpack.c.h.bf16 %v793_v30 }
 0x184   :  { %2040 = vtanh.f32 %v808_v47 }
 0x185   :  { %2042 = vtanh.f32 %v809_v53  ;;  %v738_v54 = vpop.f32.mrf.mxu0 }
 0x186   :  { %2044 = vtanh.f32 %v824_v48  ;;  %v739_v15 = vadd.f32 %v2541_v56, %v738_v54 }
 0x187   :  { %2046 = vtanh.f32 %v825_v24 }
 0x18a   :  { %v2041_v45 = vpop.eup %2040 }
 0x18b   :  { %v2043_v37 = vpop.eup %2042 }
 0x18c   :  { %v2045_v4 = vpop.eup %2044  ;;  %v865_v40 = vpack.c.bf16 %v2043_v37, %v2041_v45 }
 0x18d   :  { %v2047_v14 = vpop.eup %2046  ;;  %v740_v52 = vpop.f32.mrf.mxu0 }
 0x18e   :  { %v741_v10 = vadd.f32 %v2541_v56, %v740_v52  ;;  %985 = vmatmul.bf16.gmra.mxu1 %v865_v40  ;;  %v873_v43 = vpack.c.bf16 %v2047_v14, %v2045_v4 }
 0x190   :  { %v786_v55 = vpack.c.bf16 %v741_v10, %v739_v15  ;;  %1025 = vmatmul.bf16.gmra.mxu3 %v873_v43 }
 0x192   :  { %v810_v63 = vunpack.c.l.bf16 %v786_v55  ;;  %v811_v11 = vunpack.c.h.bf16 %v786_v55 }
 0x194   :  { %2048 = vtanh.f32 %v810_v63 }
 0x195   :  { %2050 = vtanh.f32 %v811_v11  ;;  %v743_v25 = vpop.f32.mrf.mxu0 }
 0x196   :  { %v744_v18 = vadd.f32 %v2541_v56, %v743_v25 }
 0x19a   :  { %v2049_v38 = vpop.eup %2048 }
 0x19b   :  { %v2051_v39 = vpop.eup %2050  ;;  %v951_v42 = vpop.f32.mrf.mxu1 }
 0x19c   :  { %v866_v16 = vpack.c.bf16 %v2051_v39, %v2049_v38  ;;  %v952_v59 = vadd.f32 %v2616_v57, %v951_v42 }
 0x19d   :  { %v745_v20 = vpop.f32.mrf.mxu0 }
 0x19e   :  { %v746_v46 = vadd.f32 %v2541_v56, %v745_v20  ;;  %990 = vmatmul.bf16.gmra.mxu1 %v866_v16 }
 0x1a0   :  { %v787_v3 = vpack.c.bf16 %v746_v46, %v744_v18 }
 0x1a2   :  { %v812_v8 = vunpack.c.l.bf16 %v787_v3  ;;  %v813_v23 = vunpack.c.h.bf16 %v787_v3 }
 0x1a3   :  { %v953_v41 = vpop.f32.mrf.mxu1 }
 0x1a4   :  { %2052 = vtanh.f32 %v812_v8  ;;  %v954_v0 = vadd.f32 %v2616_v57, %v953_v41 }
 0x1a5   :  { %2054 = vtanh.f32 %v813_v23  ;;  %v748_v60 = vpop.f32.mrf.mxu0 }
 0x1a6   :  { %v1031_v61 = vpack.c.bf16 %v954_v0, %v952_v59  ;;  %v749_v26 = vadd.f32 %v2541_v56, %v748_v60 }
 0x1a8   :  { %v1047_v32 = vunpack.c.l.bf16 %v1031_v61  ;;  %v1048_v28 = vunpack.c.h.bf16 %v1031_v61 }
 0x1aa   :  { %v2053_v33 = vpop.eup %2052  ;;  %2056 = vtanh.f32 %v1047_v32 }
 0x1ab   :  { %v2055_v1 = vpop.eup %2054  ;;  %2058 = vtanh.f32 %v1048_v28  ;;  %v956_v6 = vpop.f32.mrf.mxu1 }
 0x1ac   :  { %v867_v36 = vpack.c.bf16 %v2055_v1, %v2053_v33  ;;  %v957_v21 = vadd.f32 %v2616_v57, %v956_v6 }
 0x1ad   :  { %v750_v50 = vpop.f32.mrf.mxu0 }
 0x1ae   :  { %v751_v51 = vadd.f32 %v2541_v56, %v750_v50  ;;  %995 = vmatmul.bf16.gmra.mxu1 %v867_v36 }
 0x1b0   :  { %v2057_v12 = vpop.eup %2056  ;;  %v788_v13 = vpack.c.bf16 %v751_v51, %v749_v26 }
 0x1b1   :  { %v2059_v27 = vpop.eup %2058 }
 0x1b2   :  { %v814_v34 = vunpack.c.l.bf16 %v788_v13  ;;  %v815_v9 = vunpack.c.h.bf16 %v788_v13  ;;  %v1111_v31 = vpack.c.bf16 %v2059_v27, %v2057_v12 }
 0x1b3   :  { %v958_v19 = vpop.f32.mrf.mxu1 }
 0x1b4   :  { %2060 = vtanh.f32 %v814_v34  ;;  %v959_v2 = vadd.f32 %v2616_v57, %v958_v19  ;;  %1203 = vmatmul.bf16.vlgmr.msra.gmra.mxu2 %v1111_v31 }
 0x1b5   :  { %2062 = vtanh.f32 %v815_v9  ;;  %v753_v22 = vpop.f32.mrf.mxu0 }
 0x1b6   :  { %v1032_v7 = vpack.c.bf16 %v959_v2, %v957_v21  ;;  %v754_v54 = vadd.f32 %v2541_v56, %v753_v22 }
 0x1b8   :  { %v1049_v30 = vunpack.c.l.bf16 %v1032_v7  ;;  %v1050_v35 = vunpack.c.h.bf16 %v1032_v7 }
 0x1ba   :  { %v2061_v47 = vpop.eup %2060  ;;  %2064 = vtanh.f32 %v1049_v30 }
 0x1bb   :  { %v2063_v53 = vpop.eup %2062  ;;  %2066 = vtanh.f32 %v1050_v35  ;;  %v961_v48 = vpop.f32.mrf.mxu1 }
 0x1bc   :  { %v868_v24 = vpack.c.bf16 %v2063_v53, %v2061_v47  ;;  %v962_v15 = vadd.f32 %v2616_v57, %v961_v48 }
 0x1bd   :  { %v755_v49 = vpop.f32.mrf.mxu0 }
 0x1be   :  { %v756_v44 = vadd.f32 %v2541_v56, %v755_v49  ;;  %1000 = vmatmul.bf16.gmra.mxu1 %v868_v24 }
 0x1c0   :  { %v2065_v45 = vpop.eup %2064  ;;  %v789_v37 = vpack.c.bf16 %v756_v44, %v754_v54 }
 0x1c1   :  { %v2067_v4 = vpop.eup %2066 }
 0x1c2   :  { %v816_v40 = vunpack.c.l.bf16 %v789_v37  ;;  %v817_v29 = vunpack.c.h.bf16 %v789_v37  ;;  %v1112_v14 = vpack.c.bf16 %v2067_v4, %v2065_v45 }
 0x1c3   :  { %v963_v52 = vpop.f32.mrf.mxu1 }
 0x1c4   :  { %2068 = vtanh.f32 %v816_v40  ;;  %v964_v10 = vadd.f32 %v2616_v57, %v963_v52  ;;  %1208 = vmatmul.bf16.gmra.mxu2 %v1112_v14 }
 0x1c5   :  { %2070 = vtanh.f32 %v817_v29 }
 0x1c6   :  { %v1033_v43 = vpack.c.bf16 %v964_v10, %v962_v15 }
 0x1c8   :  { %v1051_v55 = vunpack.c.l.bf16 %v1033_v43  ;;  %v1052_v58 = vunpack.c.h.bf16 %v1033_v43 }
 0x1ca   :  { %v2069_v63 = vpop.eup %2068  ;;  %2072 = vtanh.f32 %v1051_v55 }
 0x1cb   :  { %v2071_v56 = vpop.eup %2070  ;;  %2074 = vtanh.f32 %v1052_v58  ;;  %v966_v11 = vpop.f32.mrf.mxu1 }
 0x1cc   :  { %v869_v25 = vpack.c.bf16 %v2071_v56, %v2069_v63  ;;  %v967_v20 = vadd.f32 %v2616_v57, %v966_v11 }
 0x1ce   :  { %1005 = vmatmul.bf16.gmra.mxu1 %v869_v25 }
 0x1d0   :  { %v2073_v38 = vpop.eup %2072 }
 0x1d1   :  { %v2075_v39 = vpop.eup %2074 }
 0x1d2   :  { %v1113_v42 = vpack.c.bf16 %v2075_v39, %v2073_v38 }
 0x1d3   :  { %v968_v16 = vpop.f32.mrf.mxu1 }
 0x1d4   :  { %v969_v18 = vadd.f32 %v2616_v57, %v968_v16  ;;  %1213 = vmatmul.bf16.gmra.mxu2 %v1113_v42 }
 0x1d6   :  { %v1034_v46 = vpack.c.bf16 %v969_v18, %v967_v20 }
 0x1d8   :  { %v1053_v3 = vunpack.c.l.bf16 %v1034_v46  ;;  %v1054_v8 = vunpack.c.h.bf16 %v1034_v46 }
 0x1da   :  { %2076 = vtanh.f32 %v1053_v3 }
 0x1db   :  { %2078 = vtanh.f32 %v1054_v8  ;;  %v971_v23 = vpop.f32.mrf.mxu1 }
 0x1dc   :  { %v972_v32 = vadd.f32 %v2616_v57, %v971_v23 }
 0x1e0   :  { %v2077_v41 = vpop.eup %2076 }
 0x1e1   :  { %v2079_v59 = vpop.eup %2078 }
 0x1e2   :  { %v1114_v0 = vpack.c.bf16 %v2079_v59, %v2077_v41 }
 0x1e3   :  { %v1011_v60 = vpop.f32.mrf.mxu3  ;;  %v973_v61 = vpop.f32.mrf.mxu1 }
 0x1e4   :  { %v974_v28 = vadd.f32 %v2616_v57, %v973_v61  ;;  %1218 = vmatmul.bf16.gmra.mxu2 %v1114_v0  ;;  %v1012_v26 = vadd.f32 %v2616_v57, %v1011_v60 }
 0x1e6   :  { %v1035_v33 = vpack.c.bf16 %v974_v28, %v972_v32 }
 0x1e8   :  { %v1055_v1 = vunpack.c.l.bf16 %v1035_v33  ;;  %v1056_v6 = vunpack.c.h.bf16 %v1035_v33 }
 0x1ea   :  { %2080 = vtanh.f32 %v1055_v1 }
 0x1eb   :  { %2082 = vtanh.f32 %v1056_v6  ;;  %v1013_v36 = vpop.f32.mrf.mxu3  ;;  %v976_v50 = vpop.f32.mrf.mxu1 }
 0x1ec   :  { %v1014_v51 = vadd.f32 %v2616_v57, %v1013_v36  ;;  %v977_v2 = vadd.f32 %v2616_v57, %v976_v50 }
 0x1ee   :  { %v1043_v12 = vpack.c.bf16 %v1014_v51, %v1012_v26 }
 0x1f0   :  { %v2081_v13 = vpop.eup %2080  ;;  %v1071_v27 = vunpack.c.l.bf16 %v1043_v12  ;;  %v1072_v34 = vunpack.c.h.bf16 %v1043_v12 }
 0x1f1   :  { %v2083_v9 = vpop.eup %2082 }
 0x1f2   :  { %2084 = vtanh.f32 %v1071_v27  ;;  %v1115_v31 = vpack.c.bf16 %v2083_v9, %v2081_v13 }
 0x1f3   :  { %2086 = vtanh.f32 %v1072_v34  ;;  %v1016_v19 = vpop.f32.mrf.mxu3  ;;  %v978_v21 = vpop.f32.mrf.mxu1 }
 0x1f4   :  { %v979_v22 = vadd.f32 %v2616_v57, %v978_v21  ;;  %1223 = vmatmul.bf16.gmra.mxu2 %v1115_v31  ;;  %v1017_v54 = vadd.f32 %v2616_v57, %v1016_v19 }
 0x1f6   :  { %v1036_v7 = vpack.c.bf16 %v979_v22, %v977_v2 }
 0x1f8   :  { %v2085_v30 = vpop.eup %2084  ;;  %v1057_v35 = vunpack.c.l.bf16 %v1036_v7  ;;  %v1058_v47 = vunpack.c.h.bf16 %v1036_v7 }
 0x1f9   :  { %v2087_v53 = vpop.eup %2086 }
 0x1fa   :  { %2088 = vtanh.f32 %v1057_v35  ;;  %v1123_v48 = vpack.c.bf16 %v2087_v53, %v2085_v30 }
 0x1fb   :  { %2090 = vtanh.f32 %v1058_v47  ;;  %v1018_v24 = vpop.f32.mrf.mxu3  ;;  %v981_v49 = vpop.f32.mrf.mxu1 }
 0x1fc   :  { %v1019_v44 = vadd.f32 %v2616_v57, %v1018_v24  ;;  %1263 = vmatmul.bf16.vlgmr.msra.gmra.mxu3 %v1123_v48  ;;  %v982_v10 = vadd.f32 %v2616_v57, %v981_v49 }
 0x1fe   :  { %v1044_v45 = vpack.c.bf16 %v1019_v44, %v1017_v54 }
 0x200   :  { %v2089_v37 = vpop.eup %2088  ;;  %v1073_v4 = vunpack.c.l.bf16 %v1044_v45  ;;  %v1074_v40 = vunpack.c.h.bf16 %v1044_v45 }
 0x201   :  { %v2091_v29 = vpop.eup %2090 }
 0x202   :  { %2092 = vtanh.f32 %v1073_v4  ;;  %v1116_v14 = vpack.c.bf16 %v2091_v29, %v2089_v37  ;;  %v1999_v4 = vld [vmem:[%s2670_s7] ss:$0 sm:$0xff]  ;;  %v1284_v29 = vsub.f32 %v2184_v5, %v1797_v17 }
 0x203   :  { %2094 = vtanh.f32 %v1074_v40  ;;  %v1021_v52 = vpop.f32.mrf.mxu3  ;;  %v983_v15 = vpop.f32.mrf.mxu1 }
 0x204   :  { %v984_v43 = vadd.f32 %v2616_v57, %v983_v15  ;;  %1228 = vmatmul.bf16.gmra.mxu2 %v1116_v14  ;;  %v1022_v42 = vadd.f32 %v2616_v57, %v1021_v52 }
 0x206   :  { %v1037_v55 = vpack.c.bf16 %v984_v43, %v982_v10 }
 0x208   :  { %v2093_v58 = vpop.eup %2092  ;;  %v1059_v63 = vunpack.c.l.bf16 %v1037_v55  ;;  %v1060_v56 = vunpack.c.h.bf16 %v1037_v55 }
 0x209   :  { %v2095_v11 = vpop.eup %2094 }
 0x20a   :  { %2096 = vtanh.f32 %v1059_v63  ;;  %v1124_v25 = vpack.c.bf16 %v2095_v11, %v2093_v58 }
 0x20b   :  { %2098 = vtanh.f32 %v1060_v56  ;;  %v1023_v38 = vpop.f32.mrf.mxu3  ;;  %v986_v39 = vpop.f32.mrf.mxu1 }
 0x20c   :  { %v1024_v16 = vadd.f32 %v2616_v57, %v1023_v38  ;;  %1268 = vmatmul.bf16.gmra.mxu3 %v1124_v25  ;;  %v987_v0 = vadd.f32 %v2616_v57, %v986_v39 }
 0x20e   :  { %v1045_v20 = vpack.c.bf16 %v1024_v16, %v1022_v42 }
 0x210   :  { %v2097_v18 = vpop.eup %2096  ;;  %v1075_v46 = vunpack.c.l.bf16 %v1045_v20  ;;  %v1076_v3 = vunpack.c.h.bf16 %v1045_v20 }
 0x211   :  { %v2099_v8 = vpop.eup %2098 }
 0x212   :  { %2100 = vtanh.f32 %v1075_v46  ;;  %v1117_v23 = vpack.c.bf16 %v2099_v8, %v2097_v18 }
 0x213   :  { %2102 = vtanh.f32 %v1076_v3  ;;  %v1026_v41 = vpop.f32.mrf.mxu3  ;;  %v988_v59 = vpop.f32.mrf.mxu1 }
 0x214   :  { %v989_v60 = vadd.f32 %v2616_v57, %v988_v59  ;;  %1233 = vmatmul.bf16.gmra.mxu2 %v1117_v23  ;;  %v1027_v26 = vadd.f32 %v2616_v57, %v1026_v41 }
 0x216   :  { %v1038_v61 = vpack.c.bf16 %v989_v60, %v987_v0 }
 0x218   :  { %v2101_v32 = vpop.eup %2100  ;;  %v1061_v28 = vunpack.c.l.bf16 %v1038_v61  ;;  %v1062_v33 = vunpack.c.h.bf16 %v1038_v61 }
 0x219   :  { %v2103_v1 = vpop.eup %2102 }
 0x21a   :  { %2104 = vtanh.f32 %v1061_v28  ;;  %v1125_v6 = vpack.c.bf16 %v2103_v1, %v2101_v32 }
 0x21b   :  { %2106 = vtanh.f32 %v1062_v33  ;;  %v1028_v36 = vpop.f32.mrf.mxu3  ;;  %v991_v50 = vpop.f32.mrf.mxu1 }
 0x21c   :  { %v1029_v51 = vadd.f32 %v2616_v57, %v1028_v36  ;;  %1273 = vmatmul.bf16.gmra.mxu3 %v1125_v6  ;;  %v992_v21 = vadd.f32 %v2616_v57, %v991_v50 }
 0x21e   :  { %v1046_v12 = vpack.c.bf16 %v1029_v51, %v1027_v26 }
 0x220   :  { %v2105_v13 = vpop.eup %2104  ;;  %v1077_v27 = vunpack.c.l.bf16 %v1046_v12  ;;  %v1078_v34 = vunpack.c.h.bf16 %v1046_v12 }
 0x221   :  { %v2107_v9 = vpop.eup %2106 }
 0x222   :  { %2108 = vtanh.f32 %v1077_v27  ;;  %v1118_v31 = vpack.c.bf16 %v2107_v9, %v2105_v13 }
 0x223   :  { %2110 = vtanh.f32 %v1078_v34  ;;  %v993_v19 = vpop.f32.mrf.mxu1 }
 0x224   :  { %v994_v2 = vadd.f32 %v2616_v57, %v993_v19  ;;  %1238 = vmatmul.bf16.gmra.mxu2 %v1118_v31 }
 0x226   :  { %v1039_v22 = vpack.c.bf16 %v994_v2, %v992_v21 }
 0x228   :  { %v2109_v7 = vpop.eup %2108  ;;  %v1063_v30 = vunpack.c.l.bf16 %v1039_v22  ;;  %v1064_v35 = vunpack.c.h.bf16 %v1039_v22 }
 0x229   :  { %v2111_v47 = vpop.eup %2110 }
 0x22a   :  { %2112 = vtanh.f32 %v1063_v30  ;;  %v1126_v53 = vpack.c.bf16 %v2111_v47, %v2109_v7 }
 0x22b   :  { %2114 = vtanh.f32 %v1064_v35  ;;  %v996_v48 = vpop.f32.mrf.mxu1 }
 0x22c   :  { %1278 = vmatmul.bf16.gmra.mxu3 %v1126_v53  ;;  %v997_v45 = vadd.f32 %v2616_v57, %v996_v48 }
 0x230   :  { %v2113_v24 = vpop.eup %2112 }
 0x231   :  { %v2115_v49 = vpop.eup %2114 }
 0x232   :  { %v1119_v54 = vpack.c.bf16 %v2115_v49, %v2113_v24 }
 0x233   :  { %v998_v44 = vpop.f32.mrf.mxu1 }
 0x234   :  { %v999_v37 = vadd.f32 %v2616_v57, %v998_v44  ;;  %1243 = vmatmul.bf16.gmra.mxu2 %v1119_v54 }
 0x236   :  { %v1040_v40 = vpack.c.bf16 %v999_v37, %v997_v45 }
 0x237   :  { %v1204_v14 = vpop.f32.mrf.mxu2 }
 0x238   :  { %v1065_v52 = vunpack.c.l.bf16 %v1040_v40  ;;  %v1066_v15 = vunpack.c.h.bf16 %v1040_v40  ;;  %v1205_v10 = vadd.f32 %v1999_v4, %v1204_v14 }
 0x23a   :  { %2116 = vtanh.f32 %v1065_v52  ;;  %v1316_v43 = vsub.f32 %v1205_v10, %v1284_v29 }
 0x23b   :  { %2118 = vtanh.f32 %v1066_v15  ;;  %v1001_v55 = vpop.f32.mrf.mxu1 }
 0x23c   :  { %v1348_v58 = vmul.f32 %v1316_v43, %v1316_v43  ;;  %v1002_v5 = vadd.f32 %v2616_v57, %v1001_v55 }
 0x23e   :  { %1606 = vst [vmem:[%s2671_s8] sm:$0xff] %v1348_v58 }
 0x23f   :  { %v1206_v63 = vpop.f32.mrf.mxu2 }
 0x240   :  { %v2117_v56 = vpop.eup %2116 }
 0x241   :  { %v2119_v11 = vpop.eup %2118 }
 0x242   :  { %v1120_v25 = vpack.c.bf16 %v2119_v11, %v2117_v56 }
 0x243   :  { %v1003_v62 = vpop.f32.mrf.mxu1 }
 0x244   :  { %v1004_v17 = vadd.f32 %v2616_v57, %v1003_v62  ;;  %1248 = vmatmul.bf16.gmra.mxu2 %v1120_v25 }
 0x246   :  { %v1041_v38 = vpack.c.bf16 %v1004_v17, %v1002_v5 }
 0x247   :  { %v1209_v39 = vpop.f32.mrf.mxu2 }
 0x248   :  { %v1067_v42 = vunpack.c.l.bf16 %v1041_v38  ;;  %v1068_v16 = vunpack.c.h.bf16 %v1041_v38 }
 0x24a   :  { %2120 = vtanh.f32 %v1067_v42 }
 0x24b   :  { %2122 = vtanh.f32 %v1068_v16  ;;  %v1006_v20 = vpop.f32.mrf.mxu1 }
 0x24c   :  { %v1007_v41 = vadd.f32 %v2616_v57, %v1006_v20 }
 0x24f   :  { %v1211_v18 = vpop.f32.mrf.mxu2 }
 0x250   :  { %v2121_v46 = vpop.eup %2120 }
 0x251   :  { %v2123_v3 = vpop.eup %2122 }
 0x252   :  { %v1121_v8 = vpack.c.bf16 %v2123_v3, %v2121_v46 }
 0x253   :  { %v1008_v23 = vpop.f32.mrf.mxu1 }
 0x254   :  { %v1009_v59 = vadd.f32 %v2616_v57, %v1008_v23  ;;  %1253 = vmatmul.bf16.gmra.mxu2 %v1121_v8 }
 0x256   :  { %v1042_v0 = vpack.c.bf16 %v1009_v59, %v1007_v41 }
 0x257   :  { %v1214_v60 = vpop.f32.mrf.mxu2 }
 0x258   :  { %v1069_v61 = vunpack.c.l.bf16 %v1042_v0  ;;  %v1070_v32 = vunpack.c.h.bf16 %v1042_v0 }
 0x25a   :  { %2124 = vtanh.f32 %v1069_v61 }
 0x25b   :  { %2126 = vtanh.f32 %v1070_v32 }
 0x25f   :  { %v1216_v28 = vpop.f32.mrf.mxu2 }
 0x260   :  { %v2125_v33 = vpop.eup %2124 }
 0x261   :  { %v2127_v1 = vpop.eup %2126 }
 0x262   :  { %v1122_v6 = vpack.c.bf16 %v2127_v1, %v2125_v33 }
 0x264   :  { %1258 = vmatmul.bf16.gmra.mxu2 %v1122_v6 }
 0x267   :  { %v1219_v36 = vpop.f32.mrf.mxu2 }
 0x26f   :  { %v1221_v50 = vpop.f32.mrf.mxu2 }
 0x277   :  { %v1224_v26 = vpop.f32.mrf.mxu2 }
 0x27f   :  { %v1264_v51 = vpop.f32.mrf.mxu3  ;;  %v1226_v12 = vpop.f32.mrf.mxu2 }
 0x287   :  { %v1266_v13 = vpop.f32.mrf.mxu3  ;;  %v1229_v27 = vpop.f32.mrf.mxu2 }
 0x28f   :  { %v1269_v57 = vpop.f32.mrf.mxu3  ;;  %v1231_v34 = vpop.f32.mrf.mxu2 }
 0x297   :  { %v1271_v9 = vpop.f32.mrf.mxu3  ;;  %v1234_v31 = vpop.f32.mrf.mxu2 }
 0x29f   :  { %v1274_v19 = vpop.f32.mrf.mxu3  ;;  %v1236_v21 = vpop.f32.mrf.mxu2 }
 0x2a7   :  { %v1276_v2 = vpop.f32.mrf.mxu3  ;;  %v1239_v22 = vpop.f32.mrf.mxu2 }
 0x2af   :  { %v1279_v7 = vpop.f32.mrf.mxu3  ;;  %v1241_v30 = vpop.f32.mrf.mxu2 }
 0x2b7   :  { %v1281_v35 = vpop.f32.mrf.mxu3  ;;  %v1244_v47 = vpop.f32.mrf.mxu2 }
 0x2bf   :  { %v1246_v53 = vpop.f32.mrf.mxu2 }
 0x2c7   :  { %v1249_v48 = vpop.f32.mrf.mxu2 }
 0x2cf   :  { %v1251_v24 = vpop.f32.mrf.mxu2 }
 0x2d7   :  { %v1254_v49 = vpop.f32.mrf.mxu2 }
 0x2df   :  { %v1256_v54 = vpop.f32.mrf.mxu2 }
 0x2e7   :  { %v1259_v44 = vpop.f32.mrf.mxu2 }
 0x2ef   :  { %v1261_v45 = vpop.f32.mrf.mxu2 }

</bundles_post_ra>
